<compile_context>
chip_gen: v5e
topology: v5e:2x2
jax: 0.10.0
libtpu: 0.0.40
codegen_flags: <defaults>
</compile_context>

<pallas_src>
import functools
import math

import jax
import jax.numpy as jnp
from jax import lax
from jax.experimental import pallas as pl
from jax.experimental.pallas import tpu as pltpu


# ----------------------------- fused MHA kernel ------------------------------
def _mha_fused_kernel(x_ref, mem_ref, wq_ref, wkv_ref, wp_ref, o_ref,
                      ent_ref=None, *, heads, head_dim):
    """One batch *block* per grid step: QKV proj + attention + out proj."""
    b_blk, T, C = x_ref.shape
    S = mem_ref.shape[1]
    cdt = jnp.bfloat16  # MXU operand dtype (accumulation stays f32)

    # Flatten the batch block so projections use b_blk*T / b_blk*S MXU rows.
    x = x_ref[...].reshape(b_blk * T, C).astype(cdt)
    mem = mem_ref[...].reshape(b_blk * S, C).astype(cdt)

    # Projections; 1/sqrt(head_dim) is pre-folded into wq_ref by the wrapper.
    q = jnp.dot(x, wq_ref[...], preferred_element_type=jnp.float32)       # (b*T, C)
    kv = jnp.dot(mem, wkv_ref[...], preferred_element_type=jnp.float32)   # (b*S, 2C)

    # Contract last dims of both operands -> q @ k.T without materializing k.T
    dn = (((1,), (1,)), ((), ()))

    if ent_ref is not None:
        ent_acc = jnp.zeros((1, 1), jnp.float32)

    # TODO(synk): the per-(b, h) unrolled tiny dots keep contraction width at
    # head_dim=32; a head-batched dot_general could raise MXU K occupancy.
    for b in range(b_blk):
        qb = q[b * T:(b + 1) * T, :]
        kvb = kv[b * S:(b + 1) * S, :]
        acc = jnp.zeros((T, C), jnp.float32)
        for h in range(heads):  # unrolled; H is small
            lo = h * head_dim
            qh = qb[:, lo:lo + head_dim].astype(cdt)            # (T, D) pre-scaled
            kh = kvb[:, lo:lo + head_dim].astype(cdt)           # (S, D)
            vh = kvb[:, C + lo:C + lo + head_dim].astype(cdt)   # (S, D)

            s = lax.dot_general(qh, kh, dimension_numbers=dn,
                                preferred_element_type=jnp.float32)       # (T, S)
            m = jnp.max(s, axis=-1, keepdims=True)
            e = jnp.exp(s - m)                                  # unnormalized probs
            denom = jnp.sum(e, axis=-1, keepdims=True)
            inv = pl.reciprocal(denom, approx=True)             # EUP slot, ~free

            # Deferred normalization: (T,D) multiply instead of a (T,S) divide.
            ov = jnp.dot(e.astype(cdt), vh,
                         preferred_element_type=jnp.float32) * inv        # (T, D)

            if ent_ref is not None:
                # -sum(p*log p) == lse - sum(e*s)*inv; no log over the (T,S) tile.
                lse = m + jnp.log(denom)                                   # (T, 1)
                ent_rows = lse - jnp.sum(e * s, axis=-1, keepdims=True) * inv
                ent_acc = ent_acc + jnp.sum(ent_rows, axis=0, keepdims=True)

            # Accumulate output projection per head; no lane-axis concatenate.
            acc = acc + jnp.dot(ov.astype(cdt), wp_ref[h],
                                preferred_element_type=jnp.float32)        # (T, C)

        o_ref[b] = acc.astype(o_ref.dtype)

    if ent_ref is not None:
        ent_ref[0] = ent_acc   # one scalar per grid step (sum over block, heads, T)


def _pick_batch_block(N, T, S, C, *, target_rows=256, vmem_budget=16 * 2**20):
    """Largest divisor of N whose fused per-step tile fits a conservative VMEM
    budget (sized with v7x's 64 MiB / 32 MiB scoped default in mind) and gives
    <= target_rows projection rows; prefers >=2 grid steps (both v7x
    TensorCores + pipeline depth) when each step can still fill >=128 rows."""
    def footprint(b):
        blocks = 2 * 4 * b * C * (2 * T + S)      # x/mem/out f32, double-buffered
        interm = 4 * b * C * (T + 2 * S)          # q, kv f32 intermediates
        weights = 2 * 2 * 4 * C * C               # bf16 weights, 2x buffered
        return blocks + interm + weights

    divisors = [d for d in range(1, N + 1) if N % d == 0]
    cands = [d for d in divisors
             if d * T <= max(target_rows, T) and footprint(d) <= vmem_budget]
    b_blk = max(cands) if cands else 1
    two_step = [d for d in cands if N // d >= 2 and d * T >= 128]
    if two_step:
        b_blk = max(two_step)
    return b_blk


def mha_forward(x, memory, wq_t_scaled, wkv_t, wp_hdc, *, heads, head_dim,
                measure_entropy=False):
    N, T, C = x.shape
    _, S, _ = memory.shape
    assert C == heads * head_dim

    b_blk = _pick_batch_block(N, T, S, C)
    nb = N // b_blk

    kernel = functools.partial(_mha_fused_kernel, heads=heads, head_dim=head_dim)
    in_specs = [
        pl.BlockSpec((b_blk, T, C), lambda n: (n, 0, 0)),         # x
        pl.BlockSpec((b_blk, S, C), lambda n: (n, 0, 0)),         # memory
        # TODO(synk): grid-invariant weights could be single-buffered at large C
        # (pl.Buffered); at C=128 the saving is noise, so left default.
        pl.BlockSpec((C, C), lambda n: (0, 0)),                   # wq.T*rsqrt(D), bf16
        pl.BlockSpec((C, 2 * C), lambda n: (0, 0)),               # [wk.T | wv.T], bf16
        pl.BlockSpec((heads, head_dim, C), lambda n: (0, 0, 0)),  # wproj.T as (H,D,C), bf16
    ]
    out_block = pl.BlockSpec((b_blk, T, C), lambda n: (n, 0, 0))

    # Explicit VMEM limit from the actual per-step footprint (v7x-safe).
    est = (2 * 2 * 4 * C * C                      # bf16 weights, double-buffered
           + 2 * 4 * b_blk * C * (2 * T + S)      # x/mem/out blocks, double-buffered
           + 4 * b_blk * C * (T + 2 * S)          # q / kv f32 intermediates
           + 8 * T * (S + C))                     # per-head temporaries + slack
    vmem_limit = int(min(max(2 * est, 8 * 2**20), 64 * 2**20))
    cparams = pltpu.CompilerParams(dimension_semantics=("parallel",),
                                   vmem_limit_bytes=vmem_limit)

    if measure_entropy:
        out, ent = pl.pallas_call(
            kernel,
            out_shape=(jax.ShapeDtypeStruct((N, T, C), x.dtype),
                       jax.ShapeDtypeStruct((nb, 1, 1), jnp.float32)),
            grid=(nb,),
            in_specs=in_specs,
            out_specs=(out_block, pl.BlockSpec((1, 1, 1), lambda n: (n, 0, 0))),
            compiler_params=cparams,
        )(x, memory, wq_t_scaled, wkv_t, wp_hdc)
        # reference: (-att*log(att+1e-8)).sum(-1).mean over dims (N, H, T)
        att_entropy = jnp.sum(ent) / (N * heads * T)
    else:
        out = pl.pallas_call(
            kernel,
            out_shape=jax.ShapeDtypeStruct((N, T, C), x.dtype),
            grid=(nb,),
            in_specs=in_specs,
            out_specs=out_block,
            compiler_params=cparams,
        )(x, memory, wq_t_scaled, wkv_t, wp_hdc)
        att_entropy = jnp.float32(-jnp.inf)
    return out, att_entropy


# ------------------------------ module wrapper -------------------------------
class MultiHeadAttentionPallas:
    def __init__(self, head_dim=32, heads=4, p_drop=0.1, key=None):
        self.head_dim = head_dim
        self.heads = heads
        self.p_drop = p_drop  # dropout is identity in eval mode
        C = head_dim * heads
        key = jax.random.PRNGKey(0) if key is None else key
        kq, kk, kv, kp = jax.random.split(key, 4)
        bound = 1.0 / math.sqrt(C)  # nn.Linear default init bound
        init = lambda k: jax.random.uniform(
            k, (C, C), jnp.float32, minval=-bound, maxval=bound
        )
        # nn.Linear layout: (Cout, Cin); kept in f32 for the reference path.
        self.wq, self.wk, self.wv, self.wproj = init(kq), init(kk), init(kv), init(kp)

        # Precomputed kernel operands (one-time, outside the kernel):
        #  * pre-transposed to (Cin, Cout), attention scale folded into wq,
        #  * k/v weights fused into one (C, 2C) operand,
        #  * wproj reshaped to (H, D, C) for per-head output accumulation,
        #  * cast to bf16: MXU bf16 rate on v6e/v7x + half the weight DMA bytes.
        scale = 1.0 / math.sqrt(head_dim)
        self.wq_t = (self.wq.T * scale).astype(jnp.bfloat16)
        self.wkv_t = jnp.concatenate([self.wk.T, self.wv.T], axis=1).astype(jnp.bfloat16)
        self.wp_hdc = self.wproj.T.reshape(heads, head_dim, C).astype(jnp.bfloat16)

    def __call__(self, x, memory, *, measure_entropy=False):
        return mha_forward(
            x, memory, self.wq_t, self.wkv_t, self.wp_hdc,
            heads=self.heads, head_dim=self.head_dim,
            measure_entropy=measure_entropy,
        )


# --------------------------------- reference ---------------------------------
def _reference(mha, x, memory):
    N, T, C = x.shape
    _, S, _ = memory.shape
    H, D = mha.heads, mha.head_dim
    q = (x @ mha.wq.T).reshape(N, T, H, D).transpose(0, 2, 1, 3)
    k = (memory @ mha.wk.T).reshape(N, S, H, D).transpose(0, 2, 1, 3)
    v = (memory @ mha.wv.T).reshape(N, S, H, D).transpose(0, 2, 1, 3)
    s = jnp.einsum("nhtd,nhsd->nhts", q, k) / math.sqrt(D)
    att = jax.nn.softmax(s, axis=-1)
    ent = jnp.mean(jnp.sum(-att * jnp.log(att + 1e-8), axis=-1))
    o = jnp.einsum("nhts,nhsd->nhtd", att, v)
    o = o.transpose(0, 2, 1, 3).reshape(N, T, C)
    return o @ mha.wproj.T, ent


if __name__ == "__main__":
    key = jax.random.PRNGKey(0)
    kx, km, kw = jax.random.split(key, 3)

    N, T, S = 2, 8, 8
    heads, head_dim = 4, 32
    C = heads * head_dim

    x = jax.random.normal(kx, (N, T, C), jnp.float32)
    memory = jax.random.normal(km, (N, S, C), jnp.float32)

    mha = MultiHeadAttentionPallas(head_dim=head_dim, heads=heads, key=kw)

    out, ent = mha(x, memory, measure_entropy=True)
    out = jax.block_until_ready(out)
    ent = jax.block_until_ready(ent)

    ref_out, ref_ent = _reference(mha, x, memory)
    # bf16 MXU operands + approx reciprocal -> loosened tolerance vs f32 ref.
    assert jnp.allclose(out, ref_out, atol=2e-2, rtol=2e-2)
    assert jnp.allclose(ent, ref_ent, atol=2e-2, rtol=2e-2)

    # default path (measure_entropy=False) returns -inf entropy
    out2, ent2 = mha(x, memory, measure_entropy=False)
    out2 = jax.block_until_ready(out2)
    assert jnp.allclose(out2, ref_out, atol=2e-2, rtol=2e-2)
    assert jnp.isneginf(ent2)

    print("KERNEL_OK")
</pallas_src>

<mosaic_0001>
module attributes {stable_mosaic.version = 11 : i64} {
  func.func @_mha_fused_kernel(%arg0: i32, %arg1: memref<2x8x128xf32, #tpu.memory_space<vmem>>, %arg2: memref<2x8x128xf32, #tpu.memory_space<vmem>>, %arg3: memref<128x128xbf16, #tpu.memory_space<vmem>>, %arg4: memref<128x256xbf16, #tpu.memory_space<vmem>>, %arg5: memref<4x32x128xbf16, #tpu.memory_space<vmem>>, %arg6: memref<2x8x128xf32, #tpu.memory_space<vmem>>, %arg7: memref<1x1x1xf32, #tpu.memory_space<vmem>>) attributes {dimension_semantics = [#tpu.dimension_semantics<parallel>], iteration_bounds = array<i64: 1>, scalar_prefetch = 0 : i64, scratch_operands = 0 : i64, tpu.core_type = #tpu.core_type<tc>, window_params = [{transform_indices = @transform_0, window_bounds = array<i64: 2, 8, 128>}, {transform_indices = @transform_1, window_bounds = array<i64: 2, 8, 128>}, {pipeline_mode = #tpu.pipeline_mode<synchronous>, transform_indices = @transform_2, window_bounds = array<i64: 128, 128>}, {pipeline_mode = #tpu.pipeline_mode<synchronous>, transform_indices = @transform_3, window_bounds = array<i64: 128, 256>}, {pipeline_mode = #tpu.pipeline_mode<synchronous>, transform_indices = @transform_4, window_bounds = array<i64: 4, 32, 128>}, {transform_indices = @transform_5, window_bounds = array<i64: 2, 8, 128>}, {transform_indices = @transform_6, window_bounds = array<i64: 1, 1, 1>}]} {
    %c0 = arith.constant 0 : index
    %c0_0 = arith.constant 0 : index
    %c0_1 = arith.constant 0 : index
    %0 = vector.load %arg1[%c0, %c0_0, %c0_1] : memref<2x8x128xf32, #tpu.memory_space<vmem>>, vector<2x8x128xf32>
    %1 = vector.shape_cast %0 : vector<2x8x128xf32> to vector<16x128xf32>
    %2 = arith.truncf %1 : vector<16x128xf32> to vector<16x128xbf16>
    %c0_2 = arith.constant 0 : index
    %c0_3 = arith.constant 0 : index
    %c0_4 = arith.constant 0 : index
    %3 = vector.load %arg2[%c0_2, %c0_3, %c0_4] : memref<2x8x128xf32, #tpu.memory_space<vmem>>, vector<2x8x128xf32>
    %4 = vector.shape_cast %3 : vector<2x8x128xf32> to vector<16x128xf32>
    %5 = arith.truncf %4 : vector<16x128xf32> to vector<16x128xbf16>
    %c0_5 = arith.constant 0 : index
    %c0_6 = arith.constant 0 : index
    %6 = vector.load %arg3[%c0_5, %c0_6] : memref<128x128xbf16, #tpu.memory_space<vmem>>, vector<128x128xbf16>
    %cst = arith.constant dense<0.000000e+00> : vector<16x128xf32>
    %7 = tpu.matmul %2, %6, %cst {dimension_numbers = #tpu.dot_dimension_numbers<[1], [0], [0], [1], [0, 0, 1, 1], [], []>} : vector<16x128xbf16>, vector<128x128xbf16>, vector<16x128xf32> -> vector<16x128xf32>
    %c0_7 = arith.constant 0 : index
    %c0_8 = arith.constant 0 : index
    %8 = vector.load %arg4[%c0_7, %c0_8] : memref<128x256xbf16, #tpu.memory_space<vmem>>, vector<128x256xbf16>
    %cst_9 = arith.constant dense<0.000000e+00> : vector<16x256xf32>
    %9 = tpu.matmul %5, %8, %cst_9 {dimension_numbers = #tpu.dot_dimension_numbers<[1], [0], [0], [1], [0, 0, 1, 1], [], []>} : vector<16x128xbf16>, vector<128x256xbf16>, vector<16x256xf32> -> vector<16x256xf32>
    %cst_10 = arith.constant 0.000000e+00 : f32
    %10 = vector.broadcast %cst_10 : f32 to vector<1x1xf32>
    %11 = vector.extract_strided_slice %7 {offsets = [0, 0], sizes = [8, 128], strides = [1, 1]} : vector<16x128xf32> to vector<8x128xf32>
    %12 = vector.extract_strided_slice %9 {offsets = [0, 0], sizes = [8, 256], strides = [1, 1]} : vector<16x256xf32> to vector<8x256xf32>
    %cst_11 = arith.constant 0.000000e+00 : f32
    %13 = vector.broadcast %cst_11 : f32 to vector<8x128xf32>
    %14 = vector.extract_strided_slice %11 {offsets = [0, 0], sizes = [8, 32], strides = [1, 1]} : vector<8x128xf32> to vector<8x32xf32>
    %15 = arith.truncf %14 : vector<8x32xf32> to vector<8x32xbf16>
    %16 = vector.extract_strided_slice %12 {offsets = [0, 0], sizes = [8, 32], strides = [1, 1]} : vector<8x256xf32> to vector<8x32xf32>
    %17 = arith.truncf %16 : vector<8x32xf32> to vector<8x32xbf16>
    %18 = vector.extract_strided_slice %12 {offsets = [0, 128], sizes = [8, 32], strides = [1, 1]} : vector<8x256xf32> to vector<8x32xf32>
    %19 = arith.truncf %18 : vector<8x32xf32> to vector<8x32xbf16>
    %cst_12 = arith.constant dense<0.000000e+00> : vector<8x8xf32>
    %20 = tpu.matmul %15, %17, %cst_12 {dimension_numbers = #tpu.dot_dimension_numbers<[1], [1], [0], [0], [0, 0, 1, 0], [], []>} : vector<8x32xbf16>, vector<8x32xbf16>, vector<8x8xf32> -> vector<8x8xf32>
    %cst_13 = arith.constant dense<0xFF800000> : vector<8xf32>
    %21 = vector.multi_reduction <maximumf>, %20, %cst_13 [1] : vector<8x8xf32> to vector<8xf32>
    %22 = vector.shape_cast %21 : vector<8xf32> to vector<8x1xf32>
    %23 = vector.broadcast %22 : vector<8x1xf32> to vector<8x8xf32>
    %24 = arith.subf %20, %23 : vector<8x8xf32>
    %25 = math.exp %24 : vector<8x8xf32>
    %cst_14 = arith.constant dense<0.000000e+00> : vector<8xf32>
    %26 = vector.multi_reduction <add>, %25, %cst_14 [1] : vector<8x8xf32> to vector<8xf32>
    %27 = vector.shape_cast %26 : vector<8xf32> to vector<8x1xf32>
    %28 = tpu.reciprocal %27 {approx = true} : vector<8x1xf32> -> vector<8x1xf32>
    %29 = arith.truncf %25 : vector<8x8xf32> to vector<8x8xbf16>
    %cst_15 = arith.constant dense<0.000000e+00> : vector<8x32xf32>
    %30 = tpu.matmul %29, %19, %cst_15 {dimension_numbers = #tpu.dot_dimension_numbers<[1], [0], [0], [1], [0, 0, 1, 1], [], []>} : vector<8x8xbf16>, vector<8x32xbf16>, vector<8x32xf32> -> vector<8x32xf32>
    %31 = vector.broadcast %28 : vector<8x1xf32> to vector<8x32xf32>
    %32 = arith.mulf %30, %31 : vector<8x32xf32>
    %33 = math.log %27 : vector<8x1xf32>
    %34 = arith.addf %22, %33 : vector<8x1xf32>
    %35 = arith.mulf %25, %20 : vector<8x8xf32>
    %cst_16 = arith.constant dense<0.000000e+00> : vector<8xf32>
    %36 = vector.multi_reduction <add>, %35, %cst_16 [1] : vector<8x8xf32> to vector<8xf32>
    %37 = vector.shape_cast %36 : vector<8xf32> to vector<8x1xf32>
    %38 = arith.mulf %37, %28 : vector<8x1xf32>
    %39 = arith.subf %34, %38 : vector<8x1xf32>
    %cst_17 = arith.constant dense<0.000000e+00> : vector<1xf32>
    %40 = vector.multi_reduction <add>, %39, %cst_17 [0] : vector<8x1xf32> to vector<1xf32>
    %41 = vector.shape_cast %40 : vector<1xf32> to vector<1x1xf32>
    %42 = arith.addf %10, %41 : vector<1x1xf32>
    %43 = arith.truncf %32 : vector<8x32xf32> to vector<8x32xbf16>
    %c0_18 = arith.constant 0 : index
    %c0_19 = arith.constant 0 : index
    %c0_20 = arith.constant 0 : index
    %44 = vector.load %arg5[%c0_18, %c0_19, %c0_20] : memref<4x32x128xbf16, #tpu.memory_space<vmem>>, vector<1x32x128xbf16>
    %45 = vector.shape_cast %44 : vector<1x32x128xbf16> to vector<32x128xbf16>
    %cst_21 = arith.constant dense<0.000000e+00> : vector<8x128xf32>
    %46 = tpu.matmul %43, %45, %cst_21 {dimension_numbers = #tpu.dot_dimension_numbers<[1], [0], [0], [1], [0, 0, 1, 1], [], []>} : vector<8x32xbf16>, vector<32x128xbf16>, vector<8x128xf32> -> vector<8x128xf32>
    %47 = arith.addf %13, %46 : vector<8x128xf32>
    %48 = vector.extract_strided_slice %11 {offsets = [0, 32], sizes = [8, 32], strides = [1, 1]} : vector<8x128xf32> to vector<8x32xf32>
    %49 = arith.truncf %48 : vector<8x32xf32> to vector<8x32xbf16>
    %50 = vector.extract_strided_slice %12 {offsets = [0, 32], sizes = [8, 32], strides = [1, 1]} : vector<8x256xf32> to vector<8x32xf32>
    %51 = arith.truncf %50 : vector<8x32xf32> to vector<8x32xbf16>
    %52 = vector.extract_strided_slice %12 {offsets = [0, 160], sizes = [8, 32], strides = [1, 1]} : vector<8x256xf32> to vector<8x32xf32>
    %53 = arith.truncf %52 : vector<8x32xf32> to vector<8x32xbf16>
    %cst_22 = arith.constant dense<0.000000e+00> : vector<8x8xf32>
    %54 = tpu.matmul %49, %51, %cst_22 {dimension_numbers = #tpu.dot_dimension_numbers<[1], [1], [0], [0], [0, 0, 1, 0], [], []>} : vector<8x32xbf16>, vector<8x32xbf16>, vector<8x8xf32> -> vector<8x8xf32>
    %cst_23 = arith.constant dense<0xFF800000> : vector<8xf32>
    %55 = vector.multi_reduction <maximumf>, %54, %cst_23 [1] : vector<8x8xf32> to vector<8xf32>
    %56 = vector.shape_cast %55 : vector<8xf32> to vector<8x1xf32>
    %57 = vector.broadcast %56 : vector<8x1xf32> to vector<8x8xf32>
    %58 = arith.subf %54, %57 : vector<8x8xf32>
    %59 = math.exp %58 : vector<8x8xf32>
    %cst_24 = arith.constant dense<0.000000e+00> : vector<8xf32>
    %60 = vector.multi_reduction <add>, %59, %cst_24 [1] : vector<8x8xf32> to vector<8xf32>
    %61 = vector.shape_cast %60 : vector<8xf32> to vector<8x1xf32>
    %62 = tpu.reciprocal %61 {approx = true} : vector<8x1xf32> -> vector<8x1xf32>
    %63 = arith.truncf %59 : vector<8x8xf32> to vector<8x8xbf16>
    %cst_25 = arith.constant dense<0.000000e+00> : vector<8x32xf32>
    %64 = tpu.matmul %63, %53, %cst_25 {dimension_numbers = #tpu.dot_dimension_numbers<[1], [0], [0], [1], [0, 0, 1, 1], [], []>} : vector<8x8xbf16>, vector<8x32xbf16>, vector<8x32xf32> -> vector<8x32xf32>
    %65 = vector.broadcast %62 : vector<8x1xf32> to vector<8x32xf32>
    %66 = arith.mulf %64, %65 : vector<8x32xf32>
    %67 = math.log %61 : vector<8x1xf32>
    %68 = arith.addf %56, %67 : vector<8x1xf32>
    %69 = arith.mulf %59, %54 : vector<8x8xf32>
    %cst_26 = arith.constant dense<0.000000e+00> : vector<8xf32>
    %70 = vector.multi_reduction <add>, %69, %cst_26 [1] : vector<8x8xf32> to vector<8xf32>
    %71 = vector.shape_cast %70 : vector<8xf32> to vector<8x1xf32>
    %72 = arith.mulf %71, %62 : vector<8x1xf32>
    %73 = arith.subf %68, %72 : vector<8x1xf32>
    %cst_27 = arith.constant dense<0.000000e+00> : vector<1xf32>
    %74 = vector.multi_reduction <add>, %73, %cst_27 [0] : vector<8x1xf32> to vector<1xf32>
    %75 = vector.shape_cast %74 : vector<1xf32> to vector<1x1xf32>
    %76 = arith.addf %42, %75 : vector<1x1xf32>
    %77 = arith.truncf %66 : vector<8x32xf32> to vector<8x32xbf16>
    %c1 = arith.constant 1 : index
    %c0_28 = arith.constant 0 : index
    %c0_29 = arith.constant 0 : index
    %78 = vector.load %arg5[%c1, %c0_28, %c0_29] : memref<4x32x128xbf16, #tpu.memory_space<vmem>>, vector<1x32x128xbf16>
    %79 = vector.shape_cast %78 : vector<1x32x128xbf16> to vector<32x128xbf16>
    %cst_30 = arith.constant dense<0.000000e+00> : vector<8x128xf32>
    %80 = tpu.matmul %77, %79, %cst_30 {dimension_numbers = #tpu.dot_dimension_numbers<[1], [0], [0], [1], [0, 0, 1, 1], [], []>} : vector<8x32xbf16>, vector<32x128xbf16>, vector<8x128xf32> -> vector<8x128xf32>
    %81 = arith.addf %47, %80 : vector<8x128xf32>
    %82 = vector.extract_strided_slice %11 {offsets = [0, 64], sizes = [8, 32], strides = [1, 1]} : vector<8x128xf32> to vector<8x32xf32>
    %83 = arith.truncf %82 : vector<8x32xf32> to vector<8x32xbf16>
    %84 = vector.extract_strided_slice %12 {offsets = [0, 64], sizes = [8, 32], strides = [1, 1]} : vector<8x256xf32> to vector<8x32xf32>
    %85 = arith.truncf %84 : vector<8x32xf32> to vector<8x32xbf16>
    %86 = vector.extract_strided_slice %12 {offsets = [0, 192], sizes = [8, 32], strides = [1, 1]} : vector<8x256xf32> to vector<8x32xf32>
    %87 = arith.truncf %86 : vector<8x32xf32> to vector<8x32xbf16>
    %cst_31 = arith.constant dense<0.000000e+00> : vector<8x8xf32>
    %88 = tpu.matmul %83, %85, %cst_31 {dimension_numbers = #tpu.dot_dimension_numbers<[1], [1], [0], [0], [0, 0, 1, 0], [], []>} : vector<8x32xbf16>, vector<8x32xbf16>, vector<8x8xf32> -> vector<8x8xf32>
    %cst_32 = arith.constant dense<0xFF800000> : vector<8xf32>
    %89 = vector.multi_reduction <maximumf>, %88, %cst_32 [1] : vector<8x8xf32> to vector<8xf32>
    %90 = vector.shape_cast %89 : vector<8xf32> to vector<8x1xf32>
    %91 = vector.broadcast %90 : vector<8x1xf32> to vector<8x8xf32>
    %92 = arith.subf %88, %91 : vector<8x8xf32>
    %93 = math.exp %92 : vector<8x8xf32>
    %cst_33 = arith.constant dense<0.000000e+00> : vector<8xf32>
    %94 = vector.multi_reduction <add>, %93, %cst_33 [1] : vector<8x8xf32> to vector<8xf32>
    %95 = vector.shape_cast %94 : vector<8xf32> to vector<8x1xf32>
    %96 = tpu.reciprocal %95 {approx = true} : vector<8x1xf32> -> vector<8x1xf32>
    %97 = arith.truncf %93 : vector<8x8xf32> to vector<8x8xbf16>
    %cst_34 = arith.constant dense<0.000000e+00> : vector<8x32xf32>
    %98 = tpu.matmul %97, %87, %cst_34 {dimension_numbers = #tpu.dot_dimension_numbers<[1], [0], [0], [1], [0, 0, 1, 1], [], []>} : vector<8x8xbf16>, vector<8x32xbf16>, vector<8x32xf32> -> vector<8x32xf32>
    %99 = vector.broadcast %96 : vector<8x1xf32> to vector<8x32xf32>
    %100 = arith.mulf %98, %99 : vector<8x32xf32>
    %101 = math.log %95 : vector<8x1xf32>
    %102 = arith.addf %90, %101 : vector<8x1xf32>
    %103 = arith.mulf %93, %88 : vector<8x8xf32>
    %cst_35 = arith.constant dense<0.000000e+00> : vector<8xf32>
    %104 = vector.multi_reduction <add>, %103, %cst_35 [1] : vector<8x8xf32> to vector<8xf32>
    %105 = vector.shape_cast %104 : vector<8xf32> to vector<8x1xf32>
    %106 = arith.mulf %105, %96 : vector<8x1xf32>
    %107 = arith.subf %102, %106 : vector<8x1xf32>
    %cst_36 = arith.constant dense<0.000000e+00> : vector<1xf32>
    %108 = vector.multi_reduction <add>, %107, %cst_36 [0] : vector<8x1xf32> to vector<1xf32>
    %109 = vector.shape_cast %108 : vector<1xf32> to vector<1x1xf32>
    %110 = arith.addf %76, %109 : vector<1x1xf32>
    %111 = arith.truncf %100 : vector<8x32xf32> to vector<8x32xbf16>
    %c2 = arith.constant 2 : index
    %c0_37 = arith.constant 0 : index
    %c0_38 = arith.constant 0 : index
    %112 = vector.load %arg5[%c2, %c0_37, %c0_38] : memref<4x32x128xbf16, #tpu.memory_space<vmem>>, vector<1x32x128xbf16>
    %113 = vector.shape_cast %112 : vector<1x32x128xbf16> to vector<32x128xbf16>
    %cst_39 = arith.constant dense<0.000000e+00> : vector<8x128xf32>
    %114 = tpu.matmul %111, %113, %cst_39 {dimension_numbers = #tpu.dot_dimension_numbers<[1], [0], [0], [1], [0, 0, 1, 1], [], []>} : vector<8x32xbf16>, vector<32x128xbf16>, vector<8x128xf32> -> vector<8x128xf32>
    %115 = arith.addf %81, %114 : vector<8x128xf32>
    %116 = vector.extract_strided_slice %11 {offsets = [0, 96], sizes = [8, 32], strides = [1, 1]} : vector<8x128xf32> to vector<8x32xf32>
    %117 = arith.truncf %116 : vector<8x32xf32> to vector<8x32xbf16>
    %118 = vector.extract_strided_slice %12 {offsets = [0, 96], sizes = [8, 32], strides = [1, 1]} : vector<8x256xf32> to vector<8x32xf32>
    %119 = arith.truncf %118 : vector<8x32xf32> to vector<8x32xbf16>
    %120 = vector.extract_strided_slice %12 {offsets = [0, 224], sizes = [8, 32], strides = [1, 1]} : vector<8x256xf32> to vector<8x32xf32>
    %121 = arith.truncf %120 : vector<8x32xf32> to vector<8x32xbf16>
    %cst_40 = arith.constant dense<0.000000e+00> : vector<8x8xf32>
    %122 = tpu.matmul %117, %119, %cst_40 {dimension_numbers = #tpu.dot_dimension_numbers<[1], [1], [0], [0], [0, 0, 1, 0], [], []>} : vector<8x32xbf16>, vector<8x32xbf16>, vector<8x8xf32> -> vector<8x8xf32>
    %cst_41 = arith.constant dense<0xFF800000> : vector<8xf32>
    %123 = vector.multi_reduction <maximumf>, %122, %cst_41 [1] : vector<8x8xf32> to vector<8xf32>
    %124 = vector.shape_cast %123 : vector<8xf32> to vector<8x1xf32>
    %125 = vector.broadcast %124 : vector<8x1xf32> to vector<8x8xf32>
    %126 = arith.subf %122, %125 : vector<8x8xf32>
    %127 = math.exp %126 : vector<8x8xf32>
    %cst_42 = arith.constant dense<0.000000e+00> : vector<8xf32>
    %128 = vector.multi_reduction <add>, %127, %cst_42 [1] : vector<8x8xf32> to vector<8xf32>
    %129 = vector.shape_cast %128 : vector<8xf32> to vector<8x1xf32>
    %130 = tpu.reciprocal %129 {approx = true} : vector<8x1xf32> -> vector<8x1xf32>
    %131 = arith.truncf %127 : vector<8x8xf32> to vector<8x8xbf16>
    %cst_43 = arith.constant dense<0.000000e+00> : vector<8x32xf32>
    %132 = tpu.matmul %131, %121, %cst_43 {dimension_numbers = #tpu.dot_dimension_numbers<[1], [0], [0], [1], [0, 0, 1, 1], [], []>} : vector<8x8xbf16>, vector<8x32xbf16>, vector<8x32xf32> -> vector<8x32xf32>
    %133 = vector.broadcast %130 : vector<8x1xf32> to vector<8x32xf32>
    %134 = arith.mulf %132, %133 : vector<8x32xf32>
    %135 = math.log %129 : vector<8x1xf32>
    %136 = arith.addf %124, %135 : vector<8x1xf32>
    %137 = arith.mulf %127, %122 : vector<8x8xf32>
    %cst_44 = arith.constant dense<0.000000e+00> : vector<8xf32>
    %138 = vector.multi_reduction <add>, %137, %cst_44 [1] : vector<8x8xf32> to vector<8xf32>
    %139 = vector.shape_cast %138 : vector<8xf32> to vector<8x1xf32>
    %140 = arith.mulf %139, %130 : vector<8x1xf32>
    %141 = arith.subf %136, %140 : vector<8x1xf32>
    %cst_45 = arith.constant dense<0.000000e+00> : vector<1xf32>
    %142 = vector.multi_reduction <add>, %141, %cst_45 [0] : vector<8x1xf32> to vector<1xf32>
    %143 = vector.shape_cast %142 : vector<1xf32> to vector<1x1xf32>
    %144 = arith.addf %110, %143 : vector<1x1xf32>
    %145 = arith.truncf %134 : vector<8x32xf32> to vector<8x32xbf16>
    %c3 = arith.constant 3 : index
    %c0_46 = arith.constant 0 : index
    %c0_47 = arith.constant 0 : index
    %146 = vector.load %arg5[%c3, %c0_46, %c0_47] : memref<4x32x128xbf16, #tpu.memory_space<vmem>>, vector<1x32x128xbf16>
    %147 = vector.shape_cast %146 : vector<1x32x128xbf16> to vector<32x128xbf16>
    %cst_48 = arith.constant dense<0.000000e+00> : vector<8x128xf32>
    %148 = tpu.matmul %145, %147, %cst_48 {dimension_numbers = #tpu.dot_dimension_numbers<[1], [0], [0], [1], [0, 0, 1, 1], [], []>} : vector<8x32xbf16>, vector<32x128xbf16>, vector<8x128xf32> -> vector<8x128xf32>
    %149 = arith.addf %115, %148 : vector<8x128xf32>
    %c0_49 = arith.constant 0 : index
    %c0_50 = arith.constant 0 : index
    %c0_51 = arith.constant 0 : index
    %150 = vector.load %arg6[%c0_49, %c0_50, %c0_51] : memref<2x8x128xf32, #tpu.memory_space<vmem>>, vector<1x8x128xf32>
    %151 = vector.shape_cast %150 : vector<1x8x128xf32> to vector<8x128xf32>
    %152 = vector.shape_cast %149 : vector<8x128xf32> to vector<1x8x128xf32>
    tpu.vector_store %arg6[%c0_49, %c0_50, %c0_51], %152 {strides = array<i32>} : memref<2x8x128xf32, #tpu.memory_space<vmem>>, vector<1x8x128xf32>,
    %153 = vector.extract_strided_slice %7 {offsets = [8, 0], sizes = [8, 128], strides = [1, 1]} : vector<16x128xf32> to vector<8x128xf32>
    %154 = vector.extract_strided_slice %9 {offsets = [8, 0], sizes = [8, 256], strides = [1, 1]} : vector<16x256xf32> to vector<8x256xf32>
    %cst_52 = arith.constant 0.000000e+00 : f32
    %155 = vector.broadcast %cst_52 : f32 to vector<8x128xf32>
    %156 = vector.extract_strided_slice %153 {offsets = [0, 0], sizes = [8, 32], strides = [1, 1]} : vector<8x128xf32> to vector<8x32xf32>
    %157 = arith.truncf %156 : vector<8x32xf32> to vector<8x32xbf16>
    %158 = vector.extract_strided_slice %154 {offsets = [0, 0], sizes = [8, 32], strides = [1, 1]} : vector<8x256xf32> to vector<8x32xf32>
    %159 = arith.truncf %158 : vector<8x32xf32> to vector<8x32xbf16>
    %160 = vector.extract_strided_slice %154 {offsets = [0, 128], sizes = [8, 32], strides = [1, 1]} : vector<8x256xf32> to vector<8x32xf32>
    %161 = arith.truncf %160 : vector<8x32xf32> to vector<8x32xbf16>
    %cst_53 = arith.constant dense<0.000000e+00> : vector<8x8xf32>
    %162 = tpu.matmul %157, %159, %cst_53 {dimension_numbers = #tpu.dot_dimension_numbers<[1], [1], [0], [0], [0, 0, 1, 0], [], []>} : vector<8x32xbf16>, vector<8x32xbf16>, vector<8x8xf32> -> vector<8x8xf32>
    %cst_54 = arith.constant dense<0xFF800000> : vector<8xf32>
    %163 = vector.multi_reduction <maximumf>, %162, %cst_54 [1] : vector<8x8xf32> to vector<8xf32>
    %164 = vector.shape_cast %163 : vector<8xf32> to vector<8x1xf32>
    %165 = vector.broadcast %164 : vector<8x1xf32> to vector<8x8xf32>
    %166 = arith.subf %162, %165 : vector<8x8xf32>
    %167 = math.exp %166 : vector<8x8xf32>
    %cst_55 = arith.constant dense<0.000000e+00> : vector<8xf32>
    %168 = vector.multi_reduction <add>, %167, %cst_55 [1] : vector<8x8xf32> to vector<8xf32>
    %169 = vector.shape_cast %168 : vector<8xf32> to vector<8x1xf32>
    %170 = tpu.reciprocal %169 {approx = true} : vector<8x1xf32> -> vector<8x1xf32>
    %171 = arith.truncf %167 : vector<8x8xf32> to vector<8x8xbf16>
    %cst_56 = arith.constant dense<0.000000e+00> : vector<8x32xf32>
    %172 = tpu.matmul %171, %161, %cst_56 {dimension_numbers = #tpu.dot_dimension_numbers<[1], [0], [0], [1], [0, 0, 1, 1], [], []>} : vector<8x8xbf16>, vector<8x32xbf16>, vector<8x32xf32> -> vector<8x32xf32>
    %173 = vector.broadcast %170 : vector<8x1xf32> to vector<8x32xf32>
    %174 = arith.mulf %172, %173 : vector<8x32xf32>
    %175 = math.log %169 : vector<8x1xf32>
    %176 = arith.addf %164, %175 : vector<8x1xf32>
    %177 = arith.mulf %167, %162 : vector<8x8xf32>
    %cst_57 = arith.constant dense<0.000000e+00> : vector<8xf32>
    %178 = vector.multi_reduction <add>, %177, %cst_57 [1] : vector<8x8xf32> to vector<8xf32>
    %179 = vector.shape_cast %178 : vector<8xf32> to vector<8x1xf32>
    %180 = arith.mulf %179, %170 : vector<8x1xf32>
    %181 = arith.subf %176, %180 : vector<8x1xf32>
    %cst_58 = arith.constant dense<0.000000e+00> : vector<1xf32>
    %182 = vector.multi_reduction <add>, %181, %cst_58 [0] : vector<8x1xf32> to vector<1xf32>
    %183 = vector.shape_cast %182 : vector<1xf32> to vector<1x1xf32>
    %184 = arith.addf %144, %183 : vector<1x1xf32>
    %185 = arith.truncf %174 : vector<8x32xf32> to vector<8x32xbf16>
    %c0_59 = arith.constant 0 : index
    %c0_60 = arith.constant 0 : index
    %c0_61 = arith.constant 0 : index
    %186 = vector.load %arg5[%c0_59, %c0_60, %c0_61] : memref<4x32x128xbf16, #tpu.memory_space<vmem>>, vector<1x32x128xbf16>
    %187 = vector.shape_cast %186 : vector<1x32x128xbf16> to vector<32x128xbf16>
    %cst_62 = arith.constant dense<0.000000e+00> : vector<8x128xf32>
    %188 = tpu.matmul %185, %187, %cst_62 {dimension_numbers = #tpu.dot_dimension_numbers<[1], [0], [0], [1], [0, 0, 1, 1], [], []>} : vector<8x32xbf16>, vector<32x128xbf16>, vector<8x128xf32> -> vector<8x128xf32>
    %189 = arith.addf %155, %188 : vector<8x128xf32>
    %190 = vector.extract_strided_slice %153 {offsets = [0, 32], sizes = [8, 32], strides = [1, 1]} : vector<8x128xf32> to vector<8x32xf32>
    %191 = arith.truncf %190 : vector<8x32xf32> to vector<8x32xbf16>
    %192 = vector.extract_strided_slice %154 {offsets = [0, 32], sizes = [8, 32], strides = [1, 1]} : vector<8x256xf32> to vector<8x32xf32>
    %193 = arith.truncf %192 : vector<8x32xf32> to vector<8x32xbf16>
    %194 = vector.extract_strided_slice %154 {offsets = [0, 160], sizes = [8, 32], strides = [1, 1]} : vector<8x256xf32> to vector<8x32xf32>
    %195 = arith.truncf %194 : vector<8x32xf32> to vector<8x32xbf16>
    %cst_63 = arith.constant dense<0.000000e+00> : vector<8x8xf32>
    %196 = tpu.matmul %191, %193, %cst_63 {dimension_numbers = #tpu.dot_dimension_numbers<[1], [1], [0], [0], [0, 0, 1, 0], [], []>} : vector<8x32xbf16>, vector<8x32xbf16>, vector<8x8xf32> -> vector<8x8xf32>
    %cst_64 = arith.constant dense<0xFF800000> : vector<8xf32>
    %197 = vector.multi_reduction <maximumf>, %196, %cst_64 [1] : vector<8x8xf32> to vector<8xf32>
    %198 = vector.shape_cast %197 : vector<8xf32> to vector<8x1xf32>
    %199 = vector.broadcast %198 : vector<8x1xf32> to vector<8x8xf32>
    %200 = arith.subf %196, %199 : vector<8x8xf32>
    %201 = math.exp %200 : vector<8x8xf32>
    %cst_65 = arith.constant dense<0.000000e+00> : vector<8xf32>
    %202 = vector.multi_reduction <add>, %201, %cst_65 [1] : vector<8x8xf32> to vector<8xf32>
    %203 = vector.shape_cast %202 : vector<8xf32> to vector<8x1xf32>
    %204 = tpu.reciprocal %203 {approx = true} : vector<8x1xf32> -> vector<8x1xf32>
    %205 = arith.truncf %201 : vector<8x8xf32> to vector<8x8xbf16>
    %cst_66 = arith.constant dense<0.000000e+00> : vector<8x32xf32>
    %206 = tpu.matmul %205, %195, %cst_66 {dimension_numbers = #tpu.dot_dimension_numbers<[1], [0], [0], [1], [0, 0, 1, 1], [], []>} : vector<8x8xbf16>, vector<8x32xbf16>, vector<8x32xf32> -> vector<8x32xf32>
    %207 = vector.broadcast %204 : vector<8x1xf32> to vector<8x32xf32>
    %208 = arith.mulf %206, %207 : vector<8x32xf32>
    %209 = math.log %203 : vector<8x1xf32>
    %210 = arith.addf %198, %209 : vector<8x1xf32>
    %211 = arith.mulf %201, %196 : vector<8x8xf32>
    %cst_67 = arith.constant dense<0.000000e+00> : vector<8xf32>
    %212 = vector.multi_reduction <add>, %211, %cst_67 [1] : vector<8x8xf32> to vector<8xf32>
    %213 = vector.shape_cast %212 : vector<8xf32> to vector<8x1xf32>
    %214 = arith.mulf %213, %204 : vector<8x1xf32>
    %215 = arith.subf %210, %214 : vector<8x1xf32>
    %cst_68 = arith.constant dense<0.000000e+00> : vector<1xf32>
    %216 = vector.multi_reduction <add>, %215, %cst_68 [0] : vector<8x1xf32> to vector<1xf32>
    %217 = vector.shape_cast %216 : vector<1xf32> to vector<1x1xf32>
    %218 = arith.addf %184, %217 : vector<1x1xf32>
    %219 = arith.truncf %208 : vector<8x32xf32> to vector<8x32xbf16>
    %c1_69 = arith.constant 1 : index
    %c0_70 = arith.constant 0 : index
    %c0_71 = arith.constant 0 : index
    %220 = vector.load %arg5[%c1_69, %c0_70, %c0_71] : memref<4x32x128xbf16, #tpu.memory_space<vmem>>, vector<1x32x128xbf16>
    %221 = vector.shape_cast %220 : vector<1x32x128xbf16> to vector<32x128xbf16>
    %cst_72 = arith.constant dense<0.000000e+00> : vector<8x128xf32>
    %222 = tpu.matmul %219, %221, %cst_72 {dimension_numbers = #tpu.dot_dimension_numbers<[1], [0], [0], [1], [0, 0, 1, 1], [], []>} : vector<8x32xbf16>, vector<32x128xbf16>, vector<8x128xf32> -> vector<8x128xf32>
    %223 = arith.addf %189, %222 : vector<8x128xf32>
    %224 = vector.extract_strided_slice %153 {offsets = [0, 64], sizes = [8, 32], strides = [1, 1]} : vector<8x128xf32> to vector<8x32xf32>
    %225 = arith.truncf %224 : vector<8x32xf32> to vector<8x32xbf16>
    %226 = vector.extract_strided_slice %154 {offsets = [0, 64], sizes = [8, 32], strides = [1, 1]} : vector<8x256xf32> to vector<8x32xf32>
    %227 = arith.truncf %226 : vector<8x32xf32> to vector<8x32xbf16>
    %228 = vector.extract_strided_slice %154 {offsets = [0, 192], sizes = [8, 32], strides = [1, 1]} : vector<8x256xf32> to vector<8x32xf32>
    %229 = arith.truncf %228 : vector<8x32xf32> to vector<8x32xbf16>
    %cst_73 = arith.constant dense<0.000000e+00> : vector<8x8xf32>
    %230 = tpu.matmul %225, %227, %cst_73 {dimension_numbers = #tpu.dot_dimension_numbers<[1], [1], [0], [0], [0, 0, 1, 0], [], []>} : vector<8x32xbf16>, vector<8x32xbf16>, vector<8x8xf32> -> vector<8x8xf32>
    %cst_74 = arith.constant dense<0xFF800000> : vector<8xf32>
    %231 = vector.multi_reduction <maximumf>, %230, %cst_74 [1] : vector<8x8xf32> to vector<8xf32>
    %232 = vector.shape_cast %231 : vector<8xf32> to vector<8x1xf32>
    %233 = vector.broadcast %232 : vector<8x1xf32> to vector<8x8xf32>
    %234 = arith.subf %230, %233 : vector<8x8xf32>
    %235 = math.exp %234 : vector<8x8xf32>
    %cst_75 = arith.constant dense<0.000000e+00> : vector<8xf32>
    %236 = vector.multi_reduction <add>, %235, %cst_75 [1] : vector<8x8xf32> to vector<8xf32>
    %237 = vector.shape_cast %236 : vector<8xf32> to vector<8x1xf32>
    %238 = tpu.reciprocal %237 {approx = true} : vector<8x1xf32> -> vector<8x1xf32>
    %239 = arith.truncf %235 : vector<8x8xf32> to vector<8x8xbf16>
    %cst_76 = arith.constant dense<0.000000e+00> : vector<8x32xf32>
    %240 = tpu.matmul %239, %229, %cst_76 {dimension_numbers = #tpu.dot_dimension_numbers<[1], [0], [0], [1], [0, 0, 1, 1], [], []>} : vector<8x8xbf16>, vector<8x32xbf16>, vector<8x32xf32> -> vector<8x32xf32>
    %241 = vector.broadcast %238 : vector<8x1xf32> to vector<8x32xf32>
    %242 = arith.mulf %240, %241 : vector<8x32xf32>
    %243 = math.log %237 : vector<8x1xf32>
    %244 = arith.addf %232, %243 : vector<8x1xf32>
    %245 = arith.mulf %235, %230 : vector<8x8xf32>
    %cst_77 = arith.constant dense<0.000000e+00> : vector<8xf32>
    %246 = vector.multi_reduction <add>, %245, %cst_77 [1] : vector<8x8xf32> to vector<8xf32>
    %247 = vector.shape_cast %246 : vector<8xf32> to vector<8x1xf32>
    %248 = arith.mulf %247, %238 : vector<8x1xf32>
    %249 = arith.subf %244, %248 : vector<8x1xf32>
    %cst_78 = arith.constant dense<0.000000e+00> : vector<1xf32>
    %250 = vector.multi_reduction <add>, %249, %cst_78 [0] : vector<8x1xf32> to vector<1xf32>
    %251 = vector.shape_cast %250 : vector<1xf32> to vector<1x1xf32>
    %252 = arith.addf %218, %251 : vector<1x1xf32>
    %253 = arith.truncf %242 : vector<8x32xf32> to vector<8x32xbf16>
    %c2_79 = arith.constant 2 : index
    %c0_80 = arith.constant 0 : index
    %c0_81 = arith.constant 0 : index
    %254 = vector.load %arg5[%c2_79, %c0_80, %c0_81] : memref<4x32x128xbf16, #tpu.memory_space<vmem>>, vector<1x32x128xbf16>
    %255 = vector.shape_cast %254 : vector<1x32x128xbf16> to vector<32x128xbf16>
    %cst_82 = arith.constant dense<0.000000e+00> : vector<8x128xf32>
    %256 = tpu.matmul %253, %255, %cst_82 {dimension_numbers = #tpu.dot_dimension_numbers<[1], [0], [0], [1], [0, 0, 1, 1], [], []>} : vector<8x32xbf16>, vector<32x128xbf16>, vector<8x128xf32> -> vector<8x128xf32>
    %257 = arith.addf %223, %256 : vector<8x128xf32>
    %258 = vector.extract_strided_slice %153 {offsets = [0, 96], sizes = [8, 32], strides = [1, 1]} : vector<8x128xf32> to vector<8x32xf32>
    %259 = arith.truncf %258 : vector<8x32xf32> to vector<8x32xbf16>
    %260 = vector.extract_strided_slice %154 {offsets = [0, 96], sizes = [8, 32], strides = [1, 1]} : vector<8x256xf32> to vector<8x32xf32>
    %261 = arith.truncf %260 : vector<8x32xf32> to vector<8x32xbf16>
    %262 = vector.extract_strided_slice %154 {offsets = [0, 224], sizes = [8, 32], strides = [1, 1]} : vector<8x256xf32> to vector<8x32xf32>
    %263 = arith.truncf %262 : vector<8x32xf32> to vector<8x32xbf16>
    %cst_83 = arith.constant dense<0.000000e+00> : vector<8x8xf32>
    %264 = tpu.matmul %259, %261, %cst_83 {dimension_numbers = #tpu.dot_dimension_numbers<[1], [1], [0], [0], [0, 0, 1, 0], [], []>} : vector<8x32xbf16>, vector<8x32xbf16>, vector<8x8xf32> -> vector<8x8xf32>
    %cst_84 = arith.constant dense<0xFF800000> : vector<8xf32>
    %265 = vector.multi_reduction <maximumf>, %264, %cst_84 [1] : vector<8x8xf32> to vector<8xf32>
    %266 = vector.shape_cast %265 : vector<8xf32> to vector<8x1xf32>
    %267 = vector.broadcast %266 : vector<8x1xf32> to vector<8x8xf32>
    %268 = arith.subf %264, %267 : vector<8x8xf32>
    %269 = math.exp %268 : vector<8x8xf32>
    %cst_85 = arith.constant dense<0.000000e+00> : vector<8xf32>
    %270 = vector.multi_reduction <add>, %269, %cst_85 [1] : vector<8x8xf32> to vector<8xf32>
    %271 = vector.shape_cast %270 : vector<8xf32> to vector<8x1xf32>
    %272 = tpu.reciprocal %271 {approx = true} : vector<8x1xf32> -> vector<8x1xf32>
    %273 = arith.truncf %269 : vector<8x8xf32> to vector<8x8xbf16>
    %cst_86 = arith.constant dense<0.000000e+00> : vector<8x32xf32>
    %274 = tpu.matmul %273, %263, %cst_86 {dimension_numbers = #tpu.dot_dimension_numbers<[1], [0], [0], [1], [0, 0, 1, 1], [], []>} : vector<8x8xbf16>, vector<8x32xbf16>, vector<8x32xf32> -> vector<8x32xf32>
    %275 = vector.broadcast %272 : vector<8x1xf32> to vector<8x32xf32>
    %276 = arith.mulf %274, %275 : vector<8x32xf32>
    %277 = math.log %271 : vector<8x1xf32>
    %278 = arith.addf %266, %277 : vector<8x1xf32>
    %279 = arith.mulf %269, %264 : vector<8x8xf32>
    %cst_87 = arith.constant dense<0.000000e+00> : vector<8xf32>
    %280 = vector.multi_reduction <add>, %279, %cst_87 [1] : vector<8x8xf32> to vector<8xf32>
    %281 = vector.shape_cast %280 : vector<8xf32> to vector<8x1xf32>
    %282 = arith.mulf %281, %272 : vector<8x1xf32>
    %283 = arith.subf %278, %282 : vector<8x1xf32>
    %cst_88 = arith.constant dense<0.000000e+00> : vector<1xf32>
    %284 = vector.multi_reduction <add>, %283, %cst_88 [0] : vector<8x1xf32> to vector<1xf32>
    %285 = vector.shape_cast %284 : vector<1xf32> to vector<1x1xf32>
    %286 = arith.addf %252, %285 : vector<1x1xf32>
    %287 = arith.truncf %276 : vector<8x32xf32> to vector<8x32xbf16>
    %c3_89 = arith.constant 3 : index
    %c0_90 = arith.constant 0 : index
    %c0_91 = arith.constant 0 : index
    %288 = vector.load %arg5[%c3_89, %c0_90, %c0_91] : memref<4x32x128xbf16, #tpu.memory_space<vmem>>, vector<1x32x128xbf16>
    %289 = vector.shape_cast %288 : vector<1x32x128xbf16> to vector<32x128xbf16>
    %cst_92 = arith.constant dense<0.000000e+00> : vector<8x128xf32>
    %290 = tpu.matmul %287, %289, %cst_92 {dimension_numbers = #tpu.dot_dimension_numbers<[1], [0], [0], [1], [0, 0, 1, 1], [], []>} : vector<8x32xbf16>, vector<32x128xbf16>, vector<8x128xf32> -> vector<8x128xf32>
    %291 = arith.addf %257, %290 : vector<8x128xf32>
    %c1_93 = arith.constant 1 : index
    %c0_94 = arith.constant 0 : index
    %c0_95 = arith.constant 0 : index
    %292 = vector.load %arg6[%c1_93, %c0_94, %c0_95] : memref<2x8x128xf32, #tpu.memory_space<vmem>>, vector<1x8x128xf32>
    %293 = vector.shape_cast %292 : vector<1x8x128xf32> to vector<8x128xf32>
    %294 = vector.shape_cast %291 : vector<8x128xf32> to vector<1x8x128xf32>
    tpu.vector_store %arg6[%c1_93, %c0_94, %c0_95], %294 {strides = array<i32>} : memref<2x8x128xf32, #tpu.memory_space<vmem>>, vector<1x8x128xf32>,
    %c0_96 = arith.constant 0 : index
    %c0_97 = arith.constant 0 : index
    %c0_98 = arith.constant 0 : index
    %295 = vector.load %arg7[%c0_96, %c0_97, %c0_98] : memref<1x1x1xf32, #tpu.memory_space<vmem>>, vector<1x1x1xf32>
    %296 = vector.shape_cast %295 : vector<1x1x1xf32> to vector<1x1xf32>
    %297 = vector.shape_cast %286 : vector<1x1xf32> to vector<1x1x1xf32>
    tpu.vector_store %arg7[%c0_96, %c0_97, %c0_98], %297 {strides = array<i32>} : memref<1x1x1xf32, #tpu.memory_space<vmem>>, vector<1x1x1xf32>,
    return
  }
  func.func @transform_0(%arg0: i32) -> (i32, i32, i32) {
    %c0_i32 = arith.constant 0 : i32
    %c0_i32_0 = arith.constant 0 : i32
    %c0_i32_1 = arith.constant 0 : i32
    return %arg0, %c0_i32, %c0_i32_0 : i32, i32, i32
  }
  func.func @transform_1(%arg0: i32) -> (i32, i32, i32) {
    %c0_i32 = arith.constant 0 : i32
    %c0_i32_0 = arith.constant 0 : i32
    %c0_i32_1 = arith.constant 0 : i32
    return %arg0, %c0_i32, %c0_i32_0 : i32, i32, i32
  }
  func.func @transform_2(%arg0: i32) -> (i32, i32) {
    %c0_i32 = arith.constant 0 : i32
    %c0_i32_0 = arith.constant 0 : i32
    %c0_i32_1 = arith.constant 0 : i32
    return %c0_i32, %c0_i32_0 : i32, i32
  }
  func.func @transform_3(%arg0: i32) -> (i32, i32) {
    %c0_i32 = arith.constant 0 : i32
    %c0_i32_0 = arith.constant 0 : i32
    %c0_i32_1 = arith.constant 0 : i32
    return %c0_i32, %c0_i32_0 : i32, i32
  }
  func.func @transform_4(%arg0: i32) -> (i32, i32, i32) {
    %c0_i32 = arith.constant 0 : i32
    %c0_i32_0 = arith.constant 0 : i32
    %c0_i32_1 = arith.constant 0 : i32
    %c0_i32_2 = arith.constant 0 : i32
    return %c0_i32, %c0_i32_0, %c0_i32_1 : i32, i32, i32
  }
  func.func @transform_5(%arg0: i32) -> (i32, i32, i32) {
    %c0_i32 = arith.constant 0 : i32
    %c0_i32_0 = arith.constant 0 : i32
    %c0_i32_1 = arith.constant 0 : i32
    return %arg0, %c0_i32, %c0_i32_0 : i32, i32, i32
  }
  func.func @transform_6(%arg0: i32) -> (i32, i32, i32) {
    %c0_i32 = arith.constant 0 : i32
    %c0_i32_0 = arith.constant 0 : i32
    %c0_i32_1 = arith.constant 0 : i32
    return %arg0, %c0_i32, %c0_i32_0 : i32, i32, i32
  }
}

</mosaic_0001>

<bundles_post_ra>
// kernel: tpu_custom_call.1
= control target key start
LH: loop header
LB: loop body
LE: loop exit
PB: predicated region body
PF: predicated region fallthrough
CT: control target
= control target key end

     0   :  { %12 = vsyncpa [#allocation3], 0  ;;  %s2025_s0 = inlined_call_operand.hbm [shape: f32[2,8,128], index: 0, kind: input, shape index: {}]   ;;  %s2026_s1 = inlined_call_operand.hbm [shape: f32[2,8,128], index: 1, kind: input, shape index: {}]   ;;  %s2027_s2 = inlined_call_operand.hbm [shape: bf16[128,128], index: 2, kind: input, shape index: {}]   ;;  %s2028_s3 = inlined_call_operand.hbm [shape: bf16[128,256], index: 3, kind: input, shape index: {}]   ;;  %s2029_s4 = inlined_call_operand.hbm [shape: bf16[4,32,128], index: 4, kind: input, shape index: {}]   ;;  %s2030_s5 = inlined_call_operand.hbm [shape: f32[2,8,128], index: 5, kind: output, shape index: {0}]   ;;  %s2031_s6 = inlined_call_operand.hbm [shape: f32[1,1,1], index: 6, kind: output, shape index: {1}]  }
   0x1   :  { %13 = vsyncpa [#allocation6], 0 }
   0x2   :  { %14 = vsyncpa [#allocation9], 0 }
   0x3   :  { %15 = vsyncpa [#allocation4], 0 }
   0x4   :  { %16 = vsyncpa [#allocation13], 0  ;;  %s34_s23 = sshll.u32 %s2026_s1, 4  ;;  %s1666_s24 = smov [#allocation5]   ;;  %s35_s23 = int_to_ptr.hbm [resolvable:$true] %s34_s23 }
   0x5   :  { %s36_s25 = sshll.u32 %s1666_s24, 4  ;;  %s60_s28 = sshll.u32 %s2028_s3, 4  ;;  %s37_s25 = int_to_ptr.vmem [resolvable:$true] %s36_s25  ;;  %s61_s28 = int_to_ptr.hbm [resolvable:$true] %s60_s28 }
   0x6   :  { %s1667_s29 = smov 128   ;;  %s1668_s30 = smov 8  }
   0x7   :  { %42 = dma.hbm_to_vmem [thread:$0]  %s35_s23, 256, %s37_s25, [#allocation6], %s1667_s29, %s1667_s29, %s1668_s30  }
   0x8   :  { %s1669_s7 = smov [#allocation8]   ;;  %s21_s1 = sshll.u32 %s2025_s0, 4  ;;  %s22_s1 = int_to_ptr.hbm [resolvable:$true] %s21_s1 }
   0x9   :  { %s62_s8 = sshll.u32 %s1669_s7, 4  ;;  %s47_s12 = sshll.u32 %s2027_s2, 4  ;;  %s63_s8 = int_to_ptr.vmem [resolvable:$true] %s62_s8  ;;  %s48_s12 = int_to_ptr.hbm [resolvable:$true] %s47_s12 }
   0xa   :  { %68 = dma.hbm_to_vmem [thread:$0]  %s61_s28, 2048, %s63_s8, [#allocation9], %s1667_s29, %s1667_s29, %s1668_s30  }
   0xb   :  { %s1670_s13 = smov [#allocation2]   ;;  %s1671_s15 = smov [#allocation7]  }
   0xc   :  { %s23_s14 = sshll.u32 %s1670_s13, 4  ;;  %s49_s0 = sshll.u32 %s1671_s15, 4  ;;  %s24_s14 = int_to_ptr.vmem [resolvable:$true] %s23_s14  ;;  %s50_s0 = int_to_ptr.vmem [resolvable:$true] %s49_s0 }
   0xd   :  { %29 = dma.hbm_to_vmem [thread:$0]  %s22_s1, 256, %s24_s14, [#allocation3], %s1667_s29, %s1667_s29, %s1668_s30  }
   0xe   :  { %s1672_s16 = smov 64   ;;  %s1673_s17 = smov 4  }
   0xf   :  { %55 = dma.hbm_to_vmem [thread:$0]  %s48_s12, 1024, %s50_s0, [#allocation6], %s1672_s16, %s1672_s16, %s1673_s17  }
  0x10   :  { %s73_s2 = sshll.u32 %s2029_s4, 4  ;;  %s1674_s20 = smov [#allocation10]   ;;  %s74_s2 = int_to_ptr.hbm [resolvable:$true] %s73_s2 }
  0x11   :  { %s75_s21 = sshll.u32 %s1674_s20, 4  ;;  %s76_s21 = int_to_ptr.vmem [resolvable:$true] %s75_s21 }
  0x12   :  { %81 = dma.hbm_to_vmem [thread:$0]  %s74_s2, 1024, %s76_s21, [#allocation9], %s1672_s16, %s1672_s16, %s1673_s17  }
  0x13   :  { %1656 = dma.done.wait [#allocation3], 256  }
  0x14   :  { %1657 = vsyncadd [#allocation3], 4294967040 }
  0x15   :  { %1658 = dma.done.wait [#allocation6], 1280  }
  0x16   :  { %1659 = vsyncadd [#allocation6], 4294966016 }
  0x17   :  { %1660 = dma.done.wait [#allocation9], 3072  }
  0x18   :  { %1661 = vsyncadd [#allocation9], 4294964224  ;;  %v1394_v0 = vld [vmem:[#allocation7 + $0x38] sm:$0xff]  ;;  %v1293_v1 = vld [vmem:[#allocation8 + $0x70] sm:$0xf]  ;;  %vm314_vm0 = vcmask 261120  }
  0x19   :  { %v1410_v2 = vld [vmem:[#allocation8 + $0x74] sm:$0xf0]  ;;  %v1285_v4 = vld [vmem:[#allocation8 + $0x60] sm:$0xf]  ;;  %v1408_v5 = vld [vmem:[#allocation8 + $0x64] sm:$0xf0]  ;;  %173 = vmatpush.bf16.msra.mxu0 %v1394_v0 }
  0x1a   :  { %v1294_v3 = vor.u32 %v1410_v2, %v1293_v1  ;;  %v1393_v6 = vld [vmem:[#allocation7 + $0x30] sm:$0xff]  ;;  %v1286_v7 = vor.u32 %v1408_v5, %v1285_v4  ;;  %v1406_v9 = vld [vmem:[#allocation8 + $0x54] sm:$0xf0]  ;;  %v1392_v10 = vld [vmem:[#allocation7 + $0x28] sm:$0xff]  ;;  %s1675_s4 = smov 96   ;;  %vm334_vm1 = vcmask 64512  }
  0x1b   :  { %v1277_v8 = vld [vmem:[#allocation8 + $0x50] sm:$0xf]  ;;  %v1269_v12 = vld [vmem:[#allocation8 + $0x40] sm:$0xf]  ;;  %v1404_v13 = vld [vmem:[#allocation8 + $0x44] sm:$0xf0] }
  0x1c   :  { %283 = vmatpush.bf16.msra.mxu1 %v1294_v3  ;;  %v1278_v11 = vor.u32 %v1406_v9, %v1277_v8  ;;  %v1391_v14 = vld [vmem:[#allocation7 + $0x20] sm:$0xff]  ;;  %v1270_v15 = vor.u32 %v1404_v13, %v1269_v12  ;;  %v1261_v16 = vld [vmem:[#allocation8 + $0x30] sm:$0xf]  ;;  %v1402_v17 = vld [vmem:[#allocation8 + $0x34] sm:$0xf0]  ;;  %vm349_vm2 = vcmask 1043456  }
  0x1d   :  { %174 = vmatpush.bf16.msra.mxu0 %v1393_v6  ;;  %v1390_v18 = vld [vmem:[#allocation7 + $0x18] sm:$0xff]  ;;  %v1262_v19 = vor.u32 %v1402_v17, %v1261_v16  ;;  %v1253_v20 = vld [vmem:[#allocation8 + $0x20] sm:$0xf]  ;;  %v1400_v21 = vld [vmem:[#allocation8 + $0x24] sm:$0xf0]  ;;  %s1676_s22 = smov 32  }
  0x1e   :  { %v1389_v22 = vld [vmem:[#allocation7 + $0x10] sm:$0xff]  ;;  %v1254_v23 = vor.u32 %v1400_v21, %v1253_v20  ;;  %v1398_v25 = vld [vmem:[#allocation8 + $0x14] sm:$0xf0]  ;;  %v1388_v26 = vld [vmem:[#allocation7 + $0x8] sm:$0xff]  ;;  %s1677_s23 = smov [#allocation12]   ;;  %s1186_s27 = sshll.u32 %s2031_s6, 4  ;;  %s1187_s27 = int_to_ptr.hbm [resolvable:$true] %s1186_s27 }
  0x1f   :  { %v1245_v24 = vld [vmem:[#allocation8 + $0x10] sm:$0xf]  ;;  %v1237_v28 = vld [vmem:[#allocation8] sm:$0xf]  ;;  %v1396_v29 = vld [vmem:[#allocation8 + $0x4] sm:$0xf0] }
  0x20   :  { %284 = vmatpush.bf16.msra.mxu1 %v1286_v7  ;;  %v1246_v27 = vor.u32 %v1398_v25, %v1245_v24  ;;  %v1387_v30 = vld [vmem:[#allocation7] sm:$0xff]  ;;  %v104_v32 = vld [vmem:[#allocation2 + $0x8] sm:$0xff]  ;;  %v1238_v33 = vor.u32 %v1396_v29, %v1237_v28  ;;  %v106_v34 = vld [vmem:[#allocation5] sm:$0xff]  ;;  %s1184_s24 = sshll.u32 %s1677_s23, 4  ;;  %vm1164_vm3 = vcmask 0   ;;  %s1678_s28 = smov [#allocation11]   ;;  %s1185_s24 = int_to_ptr.vmem [resolvable:$true] %s1184_s24 }
  0x21   :  { %175 = vmatpush.bf16.msra.mxu0 %v1392_v10  ;;  %v103_v31 = vld [vmem:[#allocation2] sm:$0xff]  ;;  %v107_v35 = vld [vmem:[#allocation5 + $0x8] sm:$0xff]  ;;  %v1409_v38 = vld [vmem:[#allocation8 + $0x74] sm:$0xf]  ;;  %s1170_s7 = sshll.u32 %s1678_s28, 4  ;;  %s1172_s10 = sshll.u32 %s2030_s5, 4  ;;  %s1171_s7 = int_to_ptr.vmem [resolvable:$true] %s1170_s7  ;;  %s1173_s10 = int_to_ptr.hbm [resolvable:$true] %s1172_s10 }
  0x22   :  { %v105_v36 = vpack.c.bf16 %v104_v32, %v103_v31  ;;  %v108_v37 = vpack.c.bf16 %v107_v35, %v106_v34  ;;  %v1295_v39 = vld [vmem:[#allocation8 + $0x78] sm:$0xf0]  ;;  %v1407_v40 = vld [vmem:[#allocation8 + $0x64] sm:$0xf]  ;;  %v1287_v42 = vld [vmem:[#allocation8 + $0x68] sm:$0xf0] }
  0x23   :  { %v1298_v41 = vor.u32 %v1409_v38, %v1295_v39  ;;  %v1290_v43 = vor.u32 %v1407_v40, %v1287_v42  ;;  %v1405_v44 = vld [vmem:[#allocation8 + $0x54] sm:$0xf]  ;;  %v1279_v45 = vld [vmem:[#allocation8 + $0x58] sm:$0xf0]  ;;  %v1403_v52 = vld [vmem:[#allocation8 + $0x44] sm:$0xf] }
  0x24   :  { %285 = vmatpush.bf16.msra.mxu1 %v1278_v11  ;;  %v1282_v46 = vor.u32 %v1405_v44, %v1279_v45  ;;  %v1271_v53 = vld [vmem:[#allocation8 + $0x48] sm:$0xf0]  ;;  %v1401_v54 = vld [vmem:[#allocation8 + $0x34] sm:$0xf]  ;;  %v1263_v56 = vld [vmem:[#allocation8 + $0x38] sm:$0xf0] }
  0x25   :  { %176 = vmatpush.bf16.msra.mxu0 %v1391_v14  ;;  %297 = vmatpush.bf16.msra.mxu2 %v1298_v41  ;;  %v1274_v55 = vor.u32 %v1403_v52, %v1271_v53  ;;  %v1266_v57 = vor.u32 %v1401_v54, %v1263_v56  ;;  %v1399_v58 = vld [vmem:[#allocation8 + $0x24] sm:$0xf]  ;;  %v1255_v59 = vld [vmem:[#allocation8 + $0x28] sm:$0xf0]  ;;  %v1397_v61 = vld [vmem:[#allocation8 + $0x14] sm:$0xf] }
  0x26   :  { %v1258_v60 = vor.u32 %v1399_v58, %v1255_v59  ;;  %v1247_v62 = vld [vmem:[#allocation8 + $0x18] sm:$0xf0]  ;;  %v1395_v0 = vld [vmem:[#allocation8 + $0x4] sm:$0xf]  ;;  %v1239_v1 = vld [vmem:[#allocation8 + $0x8] sm:$0xf0] }
  0x27   :  { %v1250_v63 = vor.u32 %v1397_v61, %v1247_v62  ;;  %v1242_v2 = vor.u32 %v1395_v0, %v1239_v1  ;;  %v1415_v52 = vld [vmem:[#allocation10 + $0x20] sm:$0xff]  ;;  %v1412_v53 = vld [vmem:[#allocation10 + $0x8] sm:$0xff] }
  0x28   :  { %286 = vmatpush.bf16.msra.mxu1 %v1270_v15  ;;  %v1411_v54 = vld [vmem:[#allocation10] sm:$0xff] }
  0x29   :  { %177 = vmatpush.bf16.msra.mxu0 %v1390_v18  ;;  %298 = vmatpush.bf16.msra.mxu2 %v1290_v43 }
  0x2c   :  { %287 = vmatpush.bf16.msra.mxu1 %v1262_v19 }
  0x2d   :  { %178 = vmatpush.bf16.msra.mxu0 %v1389_v22  ;;  %299 = vmatpush.bf16.msra.mxu2 %v1282_v46 }
  0x30   :  { %288 = vmatpush.bf16.msra.mxu1 %v1254_v23 }
  0x31   :  { %179 = vmatpush.bf16.msra.mxu0 %v1388_v26  ;;  %300 = vmatpush.bf16.msra.mxu2 %v1274_v55 }
  0x34   :  { %289 = vmatpush.bf16.msra.mxu1 %v1246_v27 }
  0x35   :  { %180 = vmatpush.bf16.msra.mxu0 %v1387_v30  ;;  %301 = vmatpush.bf16.msra.mxu2 %v1266_v57 }
  0x38   :  { %290 = vmatpush.bf16.msra.mxu1 %v1238_v33  ;;  %181 = vmatmul.bf16.vlgmr.msra.gmra.mxu0 %v105_v36 }
  0x39   :  { %302 = vmatpush.bf16.msra.mxu2 %v1258_v60 }
  0x3b   :  { %291 = vmatmul.bf16.vlgmr.msra.gmra.mxu1 %v108_v37 }
  0x3d   :  { %303 = vmatpush.bf16.msra.mxu2 %v1250_v63 }
  0x41   :  { %304 = vmatpush.bf16.msra.mxu2 %v1242_v2 }
  0x44   :  { %305 = vmatmul.bf16.vlgmr.msra.gmra.mxu2 %v108_v37 }
  0x45   :  { %518 = vmatpush.bf16.msrb.mxu2 %v1412_v53 }
  0x49   :  { %519 = vmatpush.bf16.msrb.mxu2 %v1411_v54 }
  0xb5   :  { %v182_v47 = vpop.f32.mrf.mxu0 }
  0xb6   :  { %v1742_v48 = vpack.c.bf16 %v182_v47, %v182_v47 }
  0xb8   :  { %v292_v49 = vpop.f32.mrf.mxu1  ;;  %389 = vrot.lane.b32.xlu1 %v1742_v48, %s1675_s4  ;;  %525 = vrot.lane.b32.xlu2 %v1742_v48, %s1672_s16 }
  0xb9   :  { %v1744_v50 = vpack.c.bf16 %v292_v49, %v292_v49  ;;  %v1414_v49 = vld [vmem:[#allocation10 + $0x18] sm:$0xff] }
  0xba   :  { %490 = vmatpush.bf16.msrb.mxu1 %v1414_v49 }
  0xbb   :  { %v319_v51 = vsel %vm314_vm0, %v1744_v50, 0 }
  0xbc   :  { %328 = vmatpush.bf16.xpose.msra.mxu3 %v319_v51  ;;  %v1416_v51 = vld [vmem:[#allocation10 + $0x28] sm:$0xff] }
  0xbd   :  { %v184_v45 = vpop.f32.mrf.mxu0 }
  0xbe   :  { %v1819_v46 = vpack.c.bf16 %v184_v45, %v184_v45 }
  0xc0   :  { %527 = vrot.lane.b32.xlu1 %v1744_v50, %s1672_s16  ;;  %v294_v47 = vpop.f32.mrf.mxu1 }
  0xc3   :  { %1299 = vmatmul.msk.bf16.vlgmr.msra.gmra.mxu3 %vm314_vm0, %v1742_v48 }
  0xc7   :  { %v306_v6 = vpop.f32.mrf.mxu2 }
  0xc8   :  { %v313_v7 = vpack.c.bf16 %v306_v6, %v306_v6 }
  0xca   :  { %425 = vrot.lane.b32.xlu1 %v313_v7, %s1675_s4  ;;  %v351_v8 = vsel %vm349_vm2, %v313_v7, 0 }
  0xcb   :  { %360 = vmatpush.bf16.msrb.mxu3 %v351_v8 }
 0x112   :  { %v526_v19 = vpop.permute.xlu2 %525 }
 0x12a   :  { %v390_v12 = vpop.permute.xlu1 %389 }
 0x132   :  { %v528_v15 = vpop.permute.xlu1 %527 }
 0x133   :  { %v533_v18 = vsel %vm314_vm0, %v528_v15, 0 }
 0x13c   :  { %v426_v20 = vpop.permute.xlu1 %425 }
 0x13d   :  { %v431_v23 = vsel %vm349_vm2, %v426_v20, 0 }
 0x13e   :  { %440 = vmatpush.bf16.msrb.mxu0 %v431_v23 }
 0x146   :  { %v1756_v3 = vpop.f32.mrf.mxu3 }
 0x147   :  { %v335_v4 = vsel %vm334_vm1, %v1756_v3, -inf }
 0x148   :  { %336 = vmax.xlane.f32.xlu0 %v335_v4  ;;  %v308_v4 = vpop.f32.mrf.mxu2 }
 0x14e   :  { %v332_v5 = vpop.f32.mrf.mxu3 }
 0x15c   :  { %392 = vrot.lane.b32.xlu0 %v1744_v50, %s1675_s4 }
 0x164   :  { %559 = vrot.lane.b32.xlu0 %v313_v7, %s1672_s16 }
 0x1bb   :  { %v1765_v9 = vpop.xlane.xlu0 %336 }
 0x1bc   :  { %v338_v10 = vsub.f32 %v1756_v3, %v1765_v9 }
 0x1be   :  { %v339_v11 = vmul.f32 1.442695, %v338_v10 }
 0x1c0   :  { %1440 = vpow2.f32 %v339_v11 }
 0x1c6   :  { %v1769_v13 = vpop.eup %1440 }
 0x1c7   :  { %v345_v14 = vpack.c.bf16 %v1769_v13, %v1769_v13  ;;  %v341_v44 = vsel %vm334_vm1, %v1769_v13, 0.0 }
 0x1c9   :  { %1300 = vmatmul.msk.bf16.vlgmr.msrb.gmra.mxu3 %vm334_vm1, %v345_v14 }
 0x1ce   :  { %v393_v16 = vpop.permute.xlu0 %392 }
 0x1cf   :  { %v398_v17 = vsel %vm314_vm0, %v393_v16, 0 }
 0x1d0   :  { %407 = vmatpush.bf16.xpose.msra.mxu3 %v398_v17 }
 0x1d6   :  { %v560_v21 = vpop.permute.xlu0 %559 }
 0x1d7   :  { %v565_v22 = vsel %vm349_vm2, %v560_v21, 0 }
 0x1d8   :  { %542 = vmatpush.bf16.xpose.msrb.mxu3 %v533_v18  ;;  %574 = vmatpush.bf16.msra.mxu0 %v565_v22 }
 0x1d9   :  { %1301 = vmatmul.msk.bf16.vlgmr.msra.gmra.mxu3 %vm314_vm0, %v390_v12 }
 0x1e9   :  { %1321 = vmatmul.msk.bf16.vlgmr.msrb.gmra.mxu3 %vm314_vm0, %v526_v19 }
 0x24c   :  { %v1780_v24 = vpop.f32.mrf.mxu3 }
 0x254   :  { %v364_v25 = vpop.f32.mrf.mxu3 }
 0x25c   :  { %v1782_v26 = vpop.f32.mrf.mxu3 }
 0x25d   :  { %v413_v27 = vsel %vm334_vm1, %v1782_v26, -inf }
 0x25e   :  { %414 = vmax.xlane.f32.xlu2 %v413_v27 }
 0x264   :  { %v411_v28 = vpop.f32.mrf.mxu3 }
 0x26c   :  { %v1786_v29 = vpop.f32.mrf.mxu3 }
 0x26d   :  { %v548_v30 = vsel %vm334_vm1, %v1786_v29, -inf }
 0x26e   :  { %549 = vmax.xlane.f32.xlu1 %v548_v30 }
 0x274   :  { %v546_v31 = vpop.f32.mrf.mxu3 }
 0x287   :  { %632 = vrot.lane.b32.xlu1 %v1742_v48, %s1676_s22  ;;  %v1823_v48 = vpack.c.bf16 %v294_v47, %v294_v47 }
 0x289   :  { %v747_v61 = vsel %vm314_vm0, %v1823_v48, 0 }
 0x2d1   :  { %v1792_v32 = vpop.xlane.xlu2 %414 }
 0x2d2   :  { %v416_v33 = vsub.f32 %v1782_v26, %v1792_v32 }
 0x2d4   :  { %v417_v34 = vmul.f32 1.442695, %v416_v33 }
 0x2d6   :  { %1442 = vpow2.f32 %v417_v34 }
 0x2dc   :  { %v1796_v35 = vpop.eup %1442 }
 0x2dd   :  { %v419_v36 = vsel %vm334_vm1, %v1796_v35, 0.0  ;;  %v423_v37 = vpack.c.bf16 %v1796_v35, %v1796_v35 }
 0x2de   :  { %420 = vadd.xlane.f32.xlu0 %v419_v36 }
 0x2df   :  { %1302 = vmatmul.msk.bf16.vlgmr.msrb.gmra.mxu0 %vm334_vm1, %v423_v37  ;;  %v1420_v37 = vld [vmem:[#allocation10 + $0x8] sm:$0xff] }
 0x2e1   :  { %v1803_v38 = vpop.xlane.xlu1 %549 }
 0x2e2   :  { %v551_v39 = vsub.f32 %v1786_v29, %v1803_v38 }
 0x2e4   :  { %v552_v40 = vmul.f32 1.442695, %v551_v39  ;;  %v1419_v39 = vld [vmem:[#allocation10] sm:$0xff] }
 0x2e6   :  { %1444 = vpow2.f32 %v552_v40 }
 0x2ec   :  { %v1807_v41 = vpop.eup %1444 }
 0x2ed   :  { %v554_v42 = vsel %vm334_vm1, %v1807_v41, 0.0  ;;  %v558_v43 = vpack.c.bf16 %v1807_v41, %v1807_v41 }
 0x2ee   :  { %555 = vadd.xlane.f32.xlu2 %v554_v42 }
 0x2ef   :  { %1322 = vmatmul.msk.bf16.vlgmr.msra.gmra.mxu0 %vm334_vm1, %v558_v43 }
 0x2f6   :  { %342 = vadd.xlane.f32.xlu2 %v341_v44 }
 0x2f9   :  { %v633_v18 = vpop.permute.xlu1 %632 }
 0x30e   :  { %634 = vrot.lane.b32.xlu2 %v1744_v50, %s1676_s22  ;;  %v1413_v50 = vld [vmem:[#allocation10 + $0x10] sm:$0xff] }
 0x30f   :  { %491 = vmatpush.bf16.msrb.mxu1 %v1413_v50 }
 0x313   :  { %624 = vmatpush.bf16.msra.mxu1 %v1416_v51 }
 0x316   :  { %666 = vrot.lane.b32.xlu2 %v313_v7, %s1676_s22  ;;  %v1851_v7 = vpack.c.bf16 %v308_v4, %v308_v4  ;;  %v1417_v4 = vld [vmem:[#allocation10 + $0x30] sm:$0xff] }
 0x317   :  { %625 = vmatpush.bf16.msra.mxu1 %v1415_v52 }
 0x318   :  { %v777_v15 = vsel %vm349_vm2, %v1851_v7, 0 }
 0x31e   :  { %815 = vrot.lane.b32.xlu2 %v1819_v46, %s1675_s4 }
 0x326   :  { %1058 = vrot.lane.b32.xlu2 %v1823_v48, %s1676_s22 }
 0x32e   :  { %952 = vrot.lane.b32.xlu2 %v1823_v48, %s1672_s16 }
 0x336   :  { %950 = vrot.lane.b32.xlu2 %v1819_v46, %s1672_s16 }
 0x351   :  { %v1831_v55 = vpop.xlane.xlu0 %420 }
 0x352   :  { %1446 = vrcp.f32 %v1831_v55 }
 0x358   :  { %v1834_v56 = vpop.eup %1446 }
 0x35c   :  { %v442_v57 = vpop.f32.mrf.mxu0 }
 0x35d   :  { %v446_v58 = vmul.f32 %v1834_v56, %v442_v57 }
 0x35f   :  { %v463_v59 = vpack.c.bf16 %v446_v58, %v446_v58 }
 0x361   :  { %v1837_v60 = vpop.xlane.xlu2 %555  ;;  %1311 = vmatmul.msk.bf16.vlgmr.msrb.gmra.mxu1 %vm314_vm0, %v463_v59 }
 0x362   :  { %756 = vmatpush.bf16.xpose.msrb.mxu1 %v747_v61  ;;  %1448 = vrcp.f32 %v1837_v60 }
 0x364   :  { %v444_v62 = vpop.f32.mrf.mxu0 }
 0x368   :  { %v1846_v0 = vpop.eup %1448 }
 0x369   :  { %v1843_v63 = vpop.xlane.xlu2 %342 }
 0x36a   :  { %1450 = vrcp.f32 %v1843_v63 }
 0x36c   :  { %v576_v1 = vpop.f32.mrf.mxu0 }
 0x36d   :  { %v580_v2 = vmul.f32 %v1846_v0, %v576_v1 }
 0x36f   :  { %v597_v5 = vpack.c.bf16 %v580_v2, %v580_v2  ;;  %v1418_v2 = vld [vmem:[#allocation10 + $0x38] sm:$0xff] }
 0x370   :  { %v1849_v6 = vpop.eup %1450  ;;  %731 = vmatpush.bf16.msrb.mxu0 %v1418_v2 }
 0x371   :  { %v635_v8 = vpop.permute.xlu2 %634  ;;  %1331 = vmatmul.msk.bf16.vlgmr.msra.gmra.mxu1 %vm314_vm0, %v597_v5  ;;  %v366_v10 = vmul.f32 %v1849_v6, %v1780_v24 }
 0x372   :  { %v640_v11 = vsel %vm314_vm0, %v635_v8, 0 }
 0x373   :  { %649 = vmatpush.bf16.xpose.msra.mxu2 %v640_v11  ;;  %v383_v12 = vpack.c.bf16 %v366_v10, %v366_v10 }
 0x374   :  { %v578_v14 = vpop.f32.mrf.mxu0  ;;  %732 = vmatpush.bf16.msrb.mxu0 %v1417_v4 }
 0x375   :  { %1320 = vmatmul.msk.bf16.vlgmr.msrb.gmra.mxu2 %vm314_vm0, %v383_v12 }
 0x379   :  { %v667_v16 = vpop.permute.xlu2 %666 }
 0x37a   :  { %v672_v17 = vsel %vm349_vm2, %v667_v16, 0 }
 0x37b   :  { %786 = vmatpush.bf16.msrb.mxu2 %v777_v15  ;;  %681 = vmatpush.bf16.msra.mxu3 %v672_v17 }
 0x381   :  { %1343 = vmatmul.msk.bf16.vlgmr.msrb.gmra.mxu1 %vm314_vm0, %v1819_v46  ;;  %v816_v42 = vpop.permute.xlu2 %815 }
 0x385   :  { %1332 = vmatmul.msk.bf16.vlgmr.msra.gmra.mxu2 %vm314_vm0, %v633_v18 }
 0x386   :  { %943 = vmatpush.bf16.msra.mxu2 %v1420_v37 }
 0x38a   :  { %944 = vmatpush.bf16.msra.mxu2 %v1419_v39 }
 0x3de   :  { %v493_v19 = vpop.f32.mrf.mxu1 }
 0x3e6   :  { %v495_v20 = vpop.f32.mrf.mxu1 }
 0x3ee   :  { %v627_v21 = vpop.f32.mrf.mxu1 }
 0x3f6   :  { %v629_v22 = vpop.f32.mrf.mxu1 }
 0x3f8   :  { %v521_v23 = vpop.f32.mrf.mxu2 }
 0x3f9   :  { %v522_v24 = vadd.f32 %v521_v23, %v493_v19 }
 0x3fb   :  { %v1864_v25 = vadd.f32 %v627_v21, %v522_v24 }
 0x3fe   :  { %v1866_v27 = vpop.f32.mrf.mxu1 }
 0x3ff   :  { %v762_v28 = vsel %vm334_vm1, %v1866_v27, -inf }
 0x400   :  { %v523_v30 = vpop.f32.mrf.mxu2  ;;  %763 = vmax.xlane.f32.xlu0 %v762_v28 }
 0x406   :  { %v760_v31 = vpop.f32.mrf.mxu1 }
 0x408   :  { %v1870_v33 = vpop.f32.mrf.mxu2 }
 0x409   :  { %v655_v34 = vsel %vm334_vm1, %v1870_v33, -inf }
 0x40a   :  { %656 = vmax.xlane.f32.xlu0 %v655_v34 }
 0x410   :  { %v653_v36 = vpop.f32.mrf.mxu2 }
 0x41e   :  { %818 = vrot.lane.b32.xlu0 %v1823_v48, %s1675_s4  ;;  %v1059_v48 = vpop.permute.xlu2 %1058 }
 0x41f   :  { %v1064_v52 = vsel %vm314_vm0, %v1059_v48, 0 }
 0x426   :  { %1056 = vrot.lane.b32.xlu0 %v1819_v46, %s1676_s22  ;;  %v953_v58 = vpop.permute.xlu2 %952 }
 0x427   :  { %v958_v62 = vsel %vm314_vm0, %v953_v58, 0 }
 0x42e   :  { %v951_v1 = vpop.permute.xlu2 %950 }
 0x473   :  { %v1878_v40 = vpop.xlane.xlu0 %763 }
 0x474   :  { %v765_v43 = vsub.f32 %v1866_v27, %v1878_v40 }
 0x476   :  { %v766_v44 = vmul.f32 1.442695, %v765_v43 }
 0x478   :  { %1452 = vpow2.f32 %v766_v44 }
 0x47d   :  { %v1882_v45 = vpop.xlane.xlu0 %656 }
 0x47e   :  { %v1884_v47 = vpop.eup %1452  ;;  %v658_v46 = vsub.f32 %v1870_v33, %v1882_v45 }
 0x47f   :  { %v768_v49 = vsel %vm334_vm1, %v1884_v47, 0.0  ;;  %v772_v50 = vpack.c.bf16 %v1884_v47, %v1884_v47 }
 0x480   :  { %v659_v51 = vmul.f32 1.442695, %v658_v46  ;;  %769 = vadd.xlane.f32.xlu1 %v768_v49 }
 0x481   :  { %1344 = vmatmul.msk.bf16.vlgmr.msrb.gmra.mxu2 %vm334_vm1, %v772_v50 }
 0x482   :  { %1454 = vpow2.f32 %v659_v51  ;;  %1073 = vmatpush.bf16.xpose.msrb.mxu2 %v1064_v52 }
 0x488   :  { %v1894_v53 = vpop.eup %1454 }
 0x489   :  { %v661_v54 = vsel %vm334_vm1, %v1894_v53, 0.0  ;;  %v665_v57 = vpack.c.bf16 %v1894_v53, %v1894_v53 }
 0x48a   :  { %662 = vadd.xlane.f32.xlu0 %v661_v54 }
 0x48b   :  { %1333 = vmatmul.msk.bf16.vlgmr.msra.gmra.mxu3 %vm334_vm1, %v665_v57 }
 0x490   :  { %v819_v59 = vpop.permute.xlu0 %818 }
 0x491   :  { %v824_v61 = vsel %vm314_vm0, %v819_v59, 0  ;;  %v796_v59 = vmul.f32 %v1884_v47, %v1866_v27 }
 0x492   :  { %833 = vmatpush.bf16.xpose.msrb.mxu3 %v824_v61 }
 0x493   :  { %v797_v2 = vsel %vm334_vm1, %v796_v59, 0.0 }
 0x498   :  { %v1057_v8 = vpop.permute.xlu0 %1056 }
 0x499   :  { %851 = vrot.lane.b32.xlu1 %v1851_v7, %s1675_s4 }
 0x49a   :  { %967 = vmatpush.bf16.xpose.msra.mxu3 %v958_v62 }
 0x49b   :  { %1345 = vmatmul.msk.bf16.vlgmr.msrb.gmra.mxu3 %vm314_vm0, %v816_v42 }
 0x4ab   :  { %1365 = vmatmul.msk.bf16.vlgmr.msra.gmra.mxu3 %vm314_vm0, %v951_v1 }
 0x4f3   :  { %v1907_v5 = vpop.xlane.xlu1 %769 }
 0x4f4   :  { %1456 = vrcp.f32 %v1907_v5 }
 0x4fa   :  { %v1910_v10 = vpop.eup %1456 }
 0x4fd   :  { %v1912_v12 = vpop.xlane.xlu0 %662 }
 0x4fe   :  { %1458 = vrcp.f32 %v1912_v12 }
 0x504   :  { %v788_v11 = vpop.f32.mrf.mxu2  ;;  %v1918_v19 = vpop.eup %1458 }
 0x505   :  { %v792_v14 = vmul.f32 %v1910_v10, %v788_v11 }
 0x507   :  { %v809_v15 = vpack.c.bf16 %v792_v14, %v792_v14 }
 0x509   :  { %1364 = vmatmul.msk.bf16.vlgmr.msra.gmra.mxu2 %vm314_vm0, %v809_v15 }
 0x50b   :  { %v852_v16 = vpop.permute.xlu1 %851 }
 0x50c   :  { %v857_v17 = vsel %vm349_vm2, %v852_v16, 0  ;;  %v790_v18 = vpop.f32.mrf.mxu2  ;;  %v1422_v16 = vld [vmem:[#allocation10 + $0x18] sm:$0xff] }
 0x50d   :  { %866 = vmatpush.bf16.msra.mxu0 %v857_v17  ;;  %915 = vmatpush.bf16.msra.mxu1 %v1422_v16  ;;  %v1421_v17 = vld [vmem:[#allocation10 + $0x10] sm:$0xff] }
 0x50e   :  { %v683_v20 = vpop.f32.mrf.mxu3 }
 0x50f   :  { %v687_v21 = vmul.f32 %v1918_v19, %v683_v20 }
 0x511   :  { %v704_v22 = vpack.c.bf16 %v687_v21, %v687_v21  ;;  %916 = vmatpush.bf16.msra.mxu1 %v1421_v17 }
 0x513   :  { %1342 = vmatmul.msk.bf16.vlgmr.msrb.gmra.mxu0 %vm314_vm0, %v704_v22 }
 0x516   :  { %v685_v23 = vpop.f32.mrf.mxu3 }
 0x517   :  { %v1424_v23 = vld [vmem:[#allocation10 + $0x28] sm:$0xff] }
 0x518   :  { %1048 = vmatpush.bf16.msrb.mxu1 %v1424_v23 }
 0x519   :  { %1376 = vmatmul.msk.bf16.vlgmr.msrb.gmra.mxu2 %vm314_vm0, %v1057_v8 }
 0x51e   :  { %v835_v24 = vpop.f32.mrf.mxu3 }
 0x51f   :  { %v839_v28 = vsel %vm334_vm1, %v835_v24, -inf }
 0x520   :  { %840 = vmax.xlane.f32.xlu2 %v839_v28 }
 0x526   :  { %v837_v30 = vpop.f32.mrf.mxu3 }
 0x52e   :  { %v1924_v31 = vpop.f32.mrf.mxu3 }
 0x52f   :  { %v973_v34 = vsel %vm334_vm1, %v1924_v31, -inf }
 0x530   :  { %974 = vmax.xlane.f32.xlu0 %v973_v34 }
 0x536   :  { %v971_v36 = vpop.f32.mrf.mxu3 }
 0x538   :  { %1090 = vrot.lane.b32.xlu2 %v1851_v7, %s1676_s22 }
 0x544   :  { %984 = vrot.lane.b32.xlu0 %v1851_v7, %s1672_s16 }
 0x58c   :  { %v1932_v37 = vpop.f32.mrf.mxu2 }
 0x590   :  { %v734_v39 = vpop.f32.mrf.mxu0 }
 0x591   :  { %v738_v42 = vadd.f32 %v734_v39, %v1864_v25 }
 0x593   :  { %739 = vst [vmem:[#allocation11] sm:$0xff] %v738_v42  ;;  %v1935_v43 = vpop.xlane.xlu2 %840 }
 0x594   :  { %v842_v44 = vsub.f32 %v835_v24, %v1935_v43  ;;  %v948_v48 = vpop.f32.mrf.mxu2 }
 0x596   :  { %v843_v46 = vmul.f32 1.442695, %v842_v44 }
 0x598   :  { %1460 = vpow2.f32 %v843_v46  ;;  %v736_v49 = vpop.f32.mrf.mxu0 }
 0x599   :  { %v370_v49 = vmul.f32 %v1769_v13, %v1756_v3  ;;  %v584_v13 = vmul.f32 %v1807_v41, %v1786_v29 }
 0x59b   :  { %v1091_v50 = vpop.permute.xlu2 %1090 }
 0x59c   :  { %v1096_v51 = vsel %vm349_vm2, %v1091_v50, 0  ;;  %v1075_v52 = vpop.f32.mrf.mxu2 }
 0x59d   :  { %1105 = vmatpush.bf16.msrb.mxu3 %v1096_v51  ;;  %v1079_v7 = vsel %vm334_vm1, %v1075_v52, -inf }
 0x59e   :  { %v1461_v54 = vpop.eup %1460  ;;  %1080 = vmax.xlane.f32.xlu1 %v1079_v7 }
 0x59f   :  { %v845_v25 = vsel %vm334_vm1, %v1461_v54, 0.0  ;;  %v849_v57 = vpack.c.bf16 %v1461_v54, %v1461_v54  ;;  %v876_v11 = vmul.f32 %v1461_v54, %v835_v24  ;;  %v1423_v24 = vld [vmem:[#allocation10 + $0x20] sm:$0xff] }
 0x5a0   :  { %846 = vadd.xlane.f32.xlu0 %v845_v25  ;;  %1049 = vmatpush.bf16.msrb.mxu1 %v1423_v24  ;;  %v450_v25 = vmul.f32 %v1796_v35, %v1782_v26 }
 0x5a1   :  { %1346 = vmatmul.msk.bf16.vlgmr.msra.gmra.mxu0 %vm334_vm1, %v849_v57  ;;  %v877_v27 = vsel %vm334_vm1, %v876_v11, 0.0 }
 0x5a3   :  { %v1942_v58 = vpop.xlane.xlu0 %974 }
 0x5a4   :  { %v976_v61 = vsub.f32 %v1924_v31, %v1942_v58  ;;  %v1077_v62 = vpop.f32.mrf.mxu2 }
 0x5a5   :  { %v451_v62 = vsel %vm334_vm1, %v450_v25, 0.0 }
 0x5a6   :  { %v977_v1 = vmul.f32 1.442695, %v976_v61 }
 0x5a8   :  { %1462 = vpow2.f32 %v977_v1  ;;  %798 = vadd.xlane.f32.xlu0 %v797_v2  ;;  %v585_v1 = vsel %vm334_vm1, %v584_v13, 0.0 }
 0x5ae   :  { %v1949_v4 = vpop.eup %1462 }
 0x5af   :  { %v979_v8 = vsel %vm334_vm1, %v1949_v4, 0.0  ;;  %v983_v47 = vpack.c.bf16 %v1949_v4, %v1949_v4  ;;  %v1009_v41 = vmul.f32 %v1949_v4, %v1924_v31 }
 0x5b0   :  { %980 = vadd.xlane.f32.xlu2 %v979_v8 }
 0x5b6   :  { %v985_v14 = vpop.permute.xlu0 %984 }
 0x5b7   :  { %v990_v15 = vsel %vm349_vm2, %v985_v14, 0  ;;  %v1010_v14 = vsel %vm334_vm1, %v1009_v41, 0.0 }
 0x5b8   :  { %878 = vadd.xlane.f32.xlu2 %v877_v27  ;;  %999 = vmatpush.bf16.msrb.mxu0 %v990_v15  ;;  %v1426_v15 = vld [vmem:[#allocation10 + $0x38] sm:$0xff]  ;;  %v1425_v27 = vld [vmem:[#allocation10 + $0x30] sm:$0xff] }
 0x5bb   :  { %1366 = vmatmul.msk.bf16.vlgmr.msrb.gmra.mxu0 %vm334_vm1, %v983_v47 }
 0x5bc   :  { %1154 = vmatpush.bf16.msra.mxu0 %v1426_v15 }
 0x5c0   :  { %1155 = vmatpush.bf16.msra.mxu0 %v1425_v27 }
 0x611   :  { %v1958_v18 = vpop.xlane.xlu1 %1080 }
 0x612   :  { %v1082_v20 = vsub.f32 %v1075_v52, %v1958_v18 }
 0x613   :  { %v847_v22 = vpop.xlane.xlu0 %846 }
 0x614   :  { %v1083_v21 = vmul.f32 1.442695, %v1082_v20 }
 0x616   :  { %1464 = vpow2.f32 %v1083_v21 }
 0x617   :  { %1466 = vrcp.f32 %v847_v22 }
 0x618   :  { %1468 = vlog2.f32 %v847_v22 }
 0x61c   :  { %v1465_v28 = vpop.eup %1464 }
 0x61d   :  { %v1085_v30 = vsel %vm334_vm1, %v1465_v28, 0.0  ;;  %v1089_v34 = vpack.c.bf16 %v1465_v28, %v1465_v28  ;;  %v1115_v36 = vmul.f32 %v1465_v28, %v1075_v52  ;;  %v1467_v39 = vpop.eup %1466  ;;  %v371_v52 = vsel %vm334_vm1, %v370_v49, 0.0  ;;  %v799_v28 = vpop.xlane.xlu0 %798 }
 0x61e   :  { %1086 = vadd.xlane.f32.xlu1 %v1085_v30  ;;  %v868_v42 = vpop.f32.mrf.mxu0  ;;  %v1469_v51 = vpop.eup %1468 }
 0x61f   :  { %v872_v44 = vmul.f32 %v1467_v39, %v868_v42  ;;  %1377 = vmatmul.msk.bf16.vlgmr.msrb.gmra.mxu3 %vm334_vm1, %v1089_v34  ;;  %v1116_v48 = vsel %vm334_vm1, %v1115_v36, 0.0  ;;  %v874_v54 = vmul.f32 0.6931472, %v1469_v51  ;;  %v800_v42 = vmul.f32 %v1910_v10, %v799_v28 }
 0x620   :  { %1117 = vadd.xlane.f32.xlu0 %v1116_v48 }
 0x621   :  { %v889_v46 = vpack.c.bf16 %v872_v44, %v872_v44  ;;  %v875_v59 = vadd.f32 %v874_v54, %v1935_v43  ;;  %v691_v43 = vmul.f32 %v1894_v53, %v1870_v33 }
 0x623   :  { %v1966_v50 = vpop.xlane.xlu2 %980  ;;  %1355 = vmatmul.msk.bf16.vlgmr.msra.gmra.mxu1 %vm314_vm0, %v889_v46  ;;  %v692_v11 = vsel %vm334_vm1, %v691_v43, 0.0 }
 0x624   :  { %1470 = vrcp.f32 %v1966_v50 }
 0x625   :  { %1472 = vlog2.f32 %v1843_v63 }
 0x626   :  { %372 = vadd.xlane.f32.xlu1 %v371_v52  ;;  %v870_v7 = vpop.f32.mrf.mxu0  ;;  %1474 = vlog2.f32 %v1831_v55 }
 0x627   :  { %1476 = vlog2.f32 %v1907_v5 }
 0x628   :  { %1478 = vlog2.f32 %v1837_v60 }
 0x62a   :  { %v1980_v2 = vpop.eup %1470 }
 0x62b   :  { %v879_v57 = vpop.xlane.xlu2 %878  ;;  %v1473_v53 = vpop.eup %1472 }
 0x62c   :  { %v880_v61 = vmul.f32 %v1467_v39, %v879_v57  ;;  %v368_v47 = vmul.f32 0.6931472, %v1473_v53  ;;  %v1475_v31 = vpop.eup %1474 }
 0x62d   :  { %v448_v20 = vmul.f32 0.6931472, %v1475_v31  ;;  %v1477_v22 = vpop.eup %1476 }
 0x62e   :  { %v1974_v3 = vsub.f32 %v875_v59, %v880_v61  ;;  %452 = vadd.xlane.f32.xlu1 %v451_v62  ;;  %v369_v4 = vadd.f32 %v368_v47, %v1765_v9  ;;  %v1479_v23 = vpop.eup %1478  ;;  %v794_v60 = vmul.f32 0.6931472, %v1477_v22 }
 0x62f   :  { %v449_v5 = vadd.f32 %v448_v20, %v1792_v32  ;;  %v582_v39 = vmul.f32 0.6931472, %v1479_v23 }
 0x630   :  { %v795_v51 = vadd.f32 %v794_v60, %v1878_v40 }
 0x631   :  { %v583_v7 = vadd.f32 %v582_v39, %v1803_v38  ;;  %v882_v38 = vrot.slane %v1974_v3, 4 }
 0x636   :  { %586 = vadd.xlane.f32.xlu1 %v585_v1 }
 0x638   :  { %v1001_v26 = vpop.f32.mrf.mxu0 }
 0x639   :  { %v1005_v35 = vmul.f32 %v1980_v2, %v1001_v26 }
 0x63b   :  { %v1022_v8 = vpack.c.bf16 %v1005_v35, %v1005_v35 }
 0x63d   :  { %1375 = vmatmul.msk.bf16.vlgmr.msrb.gmra.mxu1 %vm314_vm0, %v1022_v8 }
 0x63e   :  { %693 = vadd.xlane.f32.xlu1 %v692_v11 }
 0x640   :  { %v1003_v29 = vpop.f32.mrf.mxu0 }
 0x646   :  { %1011 = vadd.xlane.f32.xlu1 %v1010_v14 }
 0x691   :  { %v1087_v33 = vpop.xlane.xlu1 %1086 }
 0x692   :  { %1480 = vrcp.f32 %v1087_v33 }
 0x693   :  { %1482 = vlog2.f32 %v1087_v33  ;;  %v1118_v8 = vpop.xlane.xlu0 %1117 }
 0x694   :  { %1484 = vlog2.f32 %v1912_v12 }
 0x695   :  { %1486 = vlog2.f32 %v1966_v50 }
 0x698   :  { %v1481_v24 = vpop.eup %1480 }
 0x699   :  { %v373_v16 = vpop.xlane.xlu1 %372  ;;  %v1483_v49 = vpop.eup %1482  ;;  %v1119_v11 = vmul.f32 %v1481_v24, %v1118_v8 }
 0x69a   :  { %v374_v17 = vmul.f32 %v1849_v6, %v373_v16  ;;  %v1485_v25 = vpop.eup %1484  ;;  %v1113_v12 = vmul.f32 0.6931472, %v1483_v49 }
 0x69b   :  { %v689_v40 = vmul.f32 0.6931472, %v1485_v25  ;;  %v1487_v27 = vpop.eup %1486 }
 0x69c   :  { %v375_v21 = vsub.f32 %v369_v4, %v374_v17  ;;  %v1114_v26 = vadd.f32 %v1113_v12, %v1958_v18  ;;  %v883_v18 = vadd.f32 %v882_v38, %v1974_v3  ;;  %v1007_v20 = vmul.f32 0.6931472, %v1487_v27 }
 0x69e   :  { %v376_v30 = vrot.slane %v375_v21, 4  ;;  %v1120_v50 = vsub.f32 %v1114_v26, %v1119_v11  ;;  %v1008_v3 = vadd.f32 %v1007_v20, %v1942_v58 }
 0x6a0   :  { %v1996_v63 = vpop.f32.mrf.mxu1  ;;  %v377_v48 = vadd.f32 %v376_v30, %v375_v21  ;;  %v1121_v21 = vrot.slane %v1120_v50, 4 }
 0x6a1   :  { %v453_v55 = vpop.xlane.xlu1 %452 }
 0x6a2   :  { %v454_v6 = vmul.f32 %v1834_v56, %v453_v55  ;;  %v1107_v34 = vpop.f32.mrf.mxu3  ;;  %v801_v56 = vsub.f32 %v795_v51, %v800_v42  ;;  %v378_v57 = vrot.slane %v377_v48, 2 }
 0x6a3   :  { %v1111_v36 = vmul.f32 %v1481_v24, %v1107_v34  ;;  %v884_v24 = vrot.slane %v883_v18, 2  ;;  %v1122_v34 = vadd.f32 %v1121_v21, %v1120_v50 }
 0x6a4   :  { %v455_v9 = vsub.f32 %v449_v5, %v454_v6  ;;  %v802_v1 = vrot.slane %v801_v56, 4  ;;  %v379_v35 = vadd.f32 %v378_v57, %v377_v48  ;;  %v947_v6 = vadd.f32 %v1932_v37, %v1996_v63 }
 0x6a5   :  { %v1128_v44 = vpack.c.bf16 %v1111_v36, %v1111_v36  ;;  %v1123_v51 = vrot.slane %v1122_v34, 2 }
 0x6a6   :  { %v456_v46 = vrot.slane %v455_v9, 4  ;;  %v803_v14 = vadd.f32 %v802_v1, %v801_v56  ;;  %v380_v33 = vrot.slane %v379_v35, 1 }
 0x6a7   :  { %1386 = vmatmul.msk.bf16.vlgmr.msra.gmra.mxu0 %vm314_vm0, %v1128_v44  ;;  %v885_v44 = vadd.f32 %v884_v24, %v883_v18 }
 0x6a8   :  { %v457_v32 = vadd.f32 %v456_v46, %v455_v9  ;;  %v920_v52 = vpop.f32.mrf.mxu1  ;;  %v804_v4 = vrot.slane %v803_v14, 2  ;;  %v381_v22 = vadd.f32 %v380_v33, %v379_v35 }
 0x6a9   :  { %v587_v54 = vpop.xlane.xlu1 %586  ;;  %v886_v56 = vrot.slane %v885_v44, 1 }
 0x6aa   :  { %v458_v59 = vrot.slane %v457_v32, 2  ;;  %v588_v10 = vmul.f32 %v1846_v0, %v587_v54  ;;  %v1109_v61 = vpop.f32.mrf.mxu3  ;;  %v690_v0 = vadd.f32 %v689_v40, %v1882_v45  ;;  %v805_v5 = vadd.f32 %v804_v4, %v803_v14 }
 0x6ab   :  { %v1124_v54 = vadd.f32 %v1123_v51, %v1122_v34  ;;  %v887_v57 = vadd.f32 %v886_v56, %v885_v44 }
 0x6ac   :  { %v459_v62 = vadd.f32 %v458_v59, %v457_v32  ;;  %v589_v13 = vsub.f32 %v583_v7, %v588_v10  ;;  %v806_v49 = vrot.slane %v805_v5, 1 }
 0x6ad   :  { %v1125_v10 = vrot.slane %v1124_v54, 1 }
 0x6ae   :  { %v590_v43 = vrot.slane %v589_v13, 4  ;;  %v460_v29 = vrot.slane %v459_v62, 1  ;;  %v807_v63 = vadd.f32 %v806_v49, %v805_v5 }
 0x6af   :  { %v1126_v40 = vadd.f32 %v1125_v10, %v1124_v54 }
 0x6b0   :  { %v591_v41 = vadd.f32 %v590_v43, %v589_v13  ;;  %v461_v16 = vadd.f32 %v460_v29, %v459_v62 }
 0x6b1   :  { %v694_v15 = vpop.xlane.xlu1 %693 }
 0x6b2   :  { %v592_v53 = vrot.slane %v591_v41, 2  ;;  %v695_v47 = vmul.f32 %v1918_v19, %v694_v15  ;;  %v462_v28 = vadd.f32 %v461_v16, %v381_v22 }
 0x6b4   :  { %v593_v17 = vadd.f32 %v592_v53, %v591_v41  ;;  %v696_v31 = vsub.f32 %v690_v0, %v695_v47 }
 0x6b6   :  { %v594_v23 = vrot.slane %v593_v17, 1  ;;  %v697_v55 = vrot.slane %v696_v31, 4 }
 0x6b8   :  { %v595_v45 = vadd.f32 %v594_v23, %v593_v17  ;;  %v698_v30 = vadd.f32 %v697_v55, %v696_v31 }
 0x6b9   :  { %v1012_v19 = vpop.xlane.xlu1 %1011 }
 0x6ba   :  { %v596_v60 = vadd.f32 %v595_v45, %v462_v28  ;;  %v699_v36 = vrot.slane %v698_v30, 2  ;;  %v1013_v9 = vmul.f32 %v1980_v2, %v1012_v19  ;;  %v1051_v39 = vpop.f32.mrf.mxu1 }
 0x6bb   :  { %v1055_v42 = vadd.f32 %v1051_v39, %v947_v6 }
 0x6bc   :  { %v700_v48 = vadd.f32 %v699_v36, %v698_v30  ;;  %v1014_v46 = vsub.f32 %v1008_v3, %v1013_v9 }
 0x6be   :  { %v701_v32 = vrot.slane %v700_v48, 1  ;;  %v1015_v52 = vrot.slane %v1014_v46, 4 }
 0x6c0   :  { %v702_v7 = vadd.f32 %v701_v32, %v700_v48  ;;  %v1016_v37 = vadd.f32 %v1015_v52, %v1014_v46 }
 0x6c2   :  { %v703_v58 = vadd.f32 %v702_v7, %v596_v60  ;;  %v1017_v25 = vrot.slane %v1016_v37, 2  ;;  %v1053_v12 = vpop.f32.mrf.mxu1 }
 0x6c4   :  { %v808_v59 = vadd.f32 %v807_v63, %v703_v58  ;;  %v1018_v2 = vadd.f32 %v1017_v25, %v1016_v37 }
 0x6c6   :  { %v1019_v61 = vrot.slane %v1018_v2, 1  ;;  %v888_v62 = vadd.f32 %v887_v57, %v808_v59 }
 0x6c8   :  { %v1020_v13 = vadd.f32 %v1019_v61, %v1018_v2 }
 0x6ca   :  { %v1021_v1 = vadd.f32 %v1020_v13, %v888_v62 }
 0x6cc   :  { %v1127_v26 = vadd.f32 %v1126_v40, %v1021_v1 }
 0x6ce   :  { %1165 = vst.msk [vmem:[#allocation12] sm:$0x1] %vm1164_vm3, %v1127_v26 }
 0x6cf   :  { %1189 = dma.vmem_to_hbm [thread:$0]  %s1185_s24, 16, %s1187_s27, [#allocation13]  }
 0x724   :  { %v1157_v35 = vpop.f32.mrf.mxu0 }
 0x725   :  { %v1161_v43 = vadd.f32 %v1157_v35, %v1055_v42 }
 0x727   :  { %1163 = vst [vmem:[#allocation11 + $0x8] sm:$0xff] %v1161_v43 }
 0x728   :  { %1178 = dma.vmem_to_hbm [thread:$0]  %s1171_s7, 256, %s1173_s10, [#allocation4], %s1667_s29, %s1667_s29, %s1668_s30  }
 0x72c   :  { %v1159_v8 = vpop.f32.mrf.mxu0 }
 0x72d   :  { %1662 = dma.done.wait [#allocation4], 256  }
 0x72e   :  { %1663 = vsyncadd [#allocation4], 4294967040 }
 0x72f   :  { %1664 = dma.done.wait [#allocation13], 16  }
 0x730   :  { %1665 = vsyncadd [#allocation13], 4294967280 }
 0x731   :  { %1198 = vsyncpa [#allocation3], 1 }
 0x732   :  { %1199 = vsyncpa [#allocation6], 1 }
 0x733   :  { %1200 = vsyncpa [#allocation9], 1 }
 0x734   :  { %1201 = vsyncpa [#allocation4], 1 }
 0x735   :  { %1202 = vsyncpa [#allocation13], 1 }

</bundles_post_ra>
